<compile_context>
chip_gen: v6e
topology: v6e:2x2x1
jax: 0.10.0
libtpu: 0.0.40
codegen_flags: <defaults>
</compile_context>

<pallas_src>
import functools

import numpy as np
import jax
import jax.numpy as jnp
from jax.experimental import pallas as pl
from jax.experimental.pallas import tpu as pltpu  # noqa: F401  (TPU backend)


# ----------------------------------------------------------------------------
# Pallas kernel: single invocation, in-kernel loop over time.
# ----------------------------------------------------------------------------
def rits_kernel(x_ref, m_ref, ms_ref, gh_ref, alpha_ref, gstat_ref,
                whr_ref, bhr_ref, wfr_ref, bfr_ref, wih1_ref, whh_ref,
                loss_ref, imp_ref):
    f32 = jnp.float32
    T = x_ref.shape[0]
    B = x_ref.shape[1]
    H = whh_ref.shape[0]

    # Hoist weight loads out of the recurrent loop.
    whr = whr_ref[...]      # [H, F]
    bhr = bhr_ref[...]      # [1, F]
    wfr = wfr_ref[...]      # [F, F]
    bfr = bfr_ref[...]      # [1, F]
    wih1 = wih1_ref[...]    # [F, 4H]
    whh = whh_ref[...]      # [H, 4H]

    def step(t, carry):
        h, c, loss = carry
        x = x_ref[t]            # [B, F]
        m = m_ref[t]            # [B, F]
        ms = ms_ref[t]          # [B, F]  mask pre-scaled by 1/(sum(m)+1e-5)
        alpha = alpha_ref[t]    # [B, F]  precomputed weight_combine output

        # temporal decay of hidden state (gamma_h precomputed outside)
        h = h * gh_ref[t]

        # history regression
        x_h = jnp.dot(h, whr, preferred_element_type=f32) + bhr
        x_c = m * x + (1.0 - m) * x_h

        # feature regression on the history-completed vector
        z_h = jnp.dot(x_c, wfr, preferred_element_type=f32) + bfr

        # combined estimate (alpha has no sigmoid in this variant, per source)
        c_h = alpha * z_h + (1.0 - alpha) * x_h

        # three masked-L1 loss terms with the normalizer folded into `ms`
        err = jnp.abs(x - x_h) + jnp.abs(x - z_h) + jnp.abs(x - c_h)
        loss = loss + jnp.sum(err * ms, keepdims=True)          # (1, 1)

        c_c = m * x + (1.0 - m) * c_h
        imp_ref[t] = c_c

        # LSTMCell: dynamic part (c_c, h) + precomputed static part
        gates = (jnp.dot(c_c, wih1, preferred_element_type=f32)
                 + jnp.dot(h, whh, preferred_element_type=f32)
                 + gstat_ref[t])                                  # [B, 4H]

        sig = jax.nn.sigmoid(gates)   # one full-vreg EUP pass
        tng = jnp.tanh(gates)         # one full-vreg EUP pass
        i_g = sig[:, 0:H]
        f_g = sig[:, H:2 * H]
        g_g = tng[:, 2 * H:3 * H]
        o_g = sig[:, 3 * H:4 * H]

        c = f_g * c + i_g * g_g
        h = o_g * jnp.tanh(c)
        return h, c, loss

    h0 = jnp.zeros((B, H), f32)
    c0 = jnp.zeros((B, H), f32)
    loss0 = jnp.zeros((1, 1), f32)
    _, _, loss = jax.lax.fori_loop(0, T, step, (h0, c0, loss0),
                                   unroll=(T <= 32))
    loss_ref[...] = loss


# ----------------------------------------------------------------------------
# Wrapper: hoists sequence-wide math to XLA, single pallas_call.
# ----------------------------------------------------------------------------
@functools.partial(jax.jit, static_argnums=2)
def rits_forward(data, params, rnn_hid_size):
    """data: [B, 10, T, F] float32. Returns (loss scalar, imputations [B, T, F])."""
    del rnn_hid_size  # hidden size inferred from the weights
    B, _, T, F = data.shape
    p = params

    # forward-direction channels, time-major [T, B, F]
    values = jnp.transpose(data[:, 0], (1, 0, 2))
    masks = jnp.transpose(data[:, 1], (1, 0, 2))
    deltas = jnp.transpose(data[:, 2], (1, 0, 2))
    s1 = jnp.transpose(data[:, 3], (1, 0, 2))
    s2 = jnp.transpose(data[:, 4], (1, 0, 2))

    # ---- state-independent math, batched over the whole sequence (XLA) ----
    gamma_h = jnp.exp(-jax.nn.relu(
        jnp.einsum('tbf,fh->tbh', deltas, p['wdh']) + p['bdh']))         # [T,B,H]
    gamma_x = jnp.exp(-jax.nn.relu(deltas * p['wdx_diag'] + p['bdx']))   # [T,B,F]
    alpha = (jnp.einsum('tbf,fg->tbg', gamma_x, p['wwc1'])
             + jnp.einsum('tbf,fg->tbg', masks, p['wwc2'])
             + p['bwc'])                                                 # [T,B,F]
    gates_static = (jnp.einsum('tbf,fg->tbg', masks, p['wih2'])
                    + jnp.einsum('tbf,fg->tbg', s1, p['wih3'])
                    + jnp.einsum('tbf,fg->tbg', s2, p['wih4'])
                    + p['bias_gates'])                                   # [T,B,4H]
    m_sum = jnp.sum(masks, axis=(1, 2), keepdims=True) + 1e-5
    m_scaled = masks / m_sum        # folds the per-step 1/(sum(m)+1e-5) divide

    out_shape = (jax.ShapeDtypeStruct((1, 1), jnp.float32),
                 jax.ShapeDtypeStruct((T, B, F), jnp.float32))

    # No grid: single invocation, every operand fully VMEM-resident
    # (one DMA in per array, one DMA out per output).
    loss, imps = pl.pallas_call(
        rits_kernel,
        out_shape=out_shape,
    )(values, masks, m_scaled, gamma_h, alpha, gates_static,
      p['whr'], p['bhr'], p['wfr'], p['bfr'], p['wih1'], p['whh'])

    return loss[0, 0], jnp.transpose(imps, (1, 0, 2))   # imputations: [B, T, F]


# ----------------------------------------------------------------------------
# Deterministic parameter init (PyTorch shapes, transposed to [in, out])
# ----------------------------------------------------------------------------
def init_params(key, num_features, rnn_hid_size):
    F, H = num_features, rnn_hid_size
    ks = jax.random.split(key, 16)

    def u(k, shape, stdv):
        return jax.random.uniform(k, shape, jnp.float32, -stdv, stdv)

    # TemporalDecay h: Linear(F -> H)
    Wdh = u(ks[0], (H, F), 1.0 / np.sqrt(H))
    bdh = u(ks[1], (H,), 1.0 / np.sqrt(H))
    # TemporalDecay x (diag): Linear(F -> F), W masked with eye
    Wdx = u(ks[2], (F, F), 1.0 / np.sqrt(F)) * jnp.eye(F, dtype=jnp.float32)
    bdx = u(ks[3], (F,), 1.0 / np.sqrt(F))
    # hist_reg: Linear(H -> F)
    Whr = u(ks[4], (F, H), 1.0 / np.sqrt(H))
    bhr = u(ks[5], (F,), 1.0 / np.sqrt(H))
    # FeatureRegression: W [F,F] masked with (1 - eye)
    Wfr = u(ks[6], (F, F), 1.0 / np.sqrt(F)) * (1.0 - jnp.eye(F, dtype=jnp.float32))
    bfr = u(ks[7], (F,), 1.0 / np.sqrt(F))
    # weight_combine: Linear(2F -> F)
    Wwc = u(ks[8], (F, 2 * F), 1.0 / np.sqrt(2 * F))
    bwc = u(ks[9], (F,), 1.0 / np.sqrt(2 * F))
    # LSTMCell(4F, H)
    stdv = 1.0 / np.sqrt(H)
    Wih = u(ks[10], (4 * H, 4 * F), stdv)
    Whh = u(ks[11], (4 * H, H), stdv)
    bih = u(ks[12], (4 * H,), stdv)
    bhh = u(ks[13], (4 * H,), stdv)

    return dict(
        wdh=Wdh.T, bdh=bdh[None, :],
        wdx=Wdx.T, wdx_diag=jnp.diag(Wdx)[None, :], bdx=bdx[None, :],
        whr=Whr.T, bhr=bhr[None, :],
        wfr=Wfr.T, bfr=bfr[None, :],
        wwc1=Wwc[:, :F].T, wwc2=Wwc[:, F:].T, bwc=bwc[None, :],
        wih1=Wih[:, 0:F].T, wih2=Wih[:, F:2 * F].T,
        wih3=Wih[:, 2 * F:3 * F].T, wih4=Wih[:, 3 * F:].T,
        whh=Whh.T,
        bias_gates=(bih + bhh)[None, :],
    )


# ----------------------------------------------------------------------------
# Pure-JAX reference (mirrors the PyTorch forward, for validation)
# ----------------------------------------------------------------------------
def rits_ref(data, p, H):
    values, masks, deltas = data[:, 0], data[:, 1], data[:, 2]
    s1a, s2a = data[:, 3], data[:, 4]
    B, T, F = values.shape
    h = jnp.zeros((B, H), jnp.float32)
    c = jnp.zeros((B, H), jnp.float32)
    loss = jnp.float32(0.0)
    imps = []
    for t in range(T):
        x, m, d = values[:, t], masks[:, t], deltas[:, t]
        s1, s2 = s1a[:, t], s2a[:, t]
        gamma_h = jnp.exp(-jax.nn.relu(d @ p['wdh'] + p['bdh']))
        gamma_x = jnp.exp(-jax.nn.relu(d @ p['wdx'] + p['bdx']))   # full diag matmul
        h = h * gamma_h
        x_h = h @ p['whr'] + p['bhr']
        msum = jnp.sum(m) + 1e-5
        loss = loss + jnp.sum(jnp.abs(x - x_h) * m) / msum
        x_c = m * x + (1 - m) * x_h
        z_h = x_c @ p['wfr'] + p['bfr']
        loss = loss + jnp.sum(jnp.abs(x - z_h) * m) / msum
        alpha = gamma_x @ p['wwc1'] + m @ p['wwc2'] + p['bwc']
        c_h = alpha * z_h + (1 - alpha) * x_h
        loss = loss + jnp.sum(jnp.abs(x - c_h) * m) / msum
        c_c = m * x + (1 - m) * c_h
        gates = (c_c @ p['wih1'] + m @ p['wih2'] + s1 @ p['wih3'] + s2 @ p['wih4']
                 + h @ p['whh'] + p['bias_gates'])
        i_g = jax.nn.sigmoid(gates[:, :H])
        f_g = jax.nn.sigmoid(gates[:, H:2 * H])
        g_g = jnp.tanh(gates[:, 2 * H:3 * H])
        o_g = jax.nn.sigmoid(gates[:, 3 * H:])
        c = f_g * c + i_g * g_g
        h = o_g * jnp.tanh(c)
        imps.append(c_c[:, None, :])
    return loss, jnp.concatenate(imps, axis=1)


if __name__ == "__main__":
    B, T, F, H = 2, 8, 4, 32  # batch, seq, num_features, rnn_hid_size

    key = jax.random.PRNGKey(0)
    k_data, k_mask, k_param = jax.random.split(key, 3)

    # data: [B, 10, T, F]; channel 1 (forward masks) made binary
    data = jax.random.normal(k_data, (B, 10, T, F), jnp.float32)
    mask_bits = (jax.random.uniform(k_mask, (B, T, F)) > 0.3).astype(jnp.float32)
    data = data.at[:, 1].set(mask_bits)
    # deltas should be non-negative time gaps
    data = data.at[:, 2].set(jnp.abs(data[:, 2]))

    params = init_params(k_param, F, H)

    loss, imputations = rits_forward(data, params, H)
    jax.block_until_ready((loss, imputations))

    loss_ref, imps_ref = rits_ref(data, params, H)
    np.testing.assert_allclose(np.asarray(loss), np.asarray(loss_ref),
                               rtol=1e-3, atol=1e-3)
    np.testing.assert_allclose(np.asarray(imputations), np.asarray(imps_ref),
                               rtol=1e-3, atol=1e-3)

    print("KERNEL_OK")
</pallas_src>

<mosaic_0001>
module attributes {stable_mosaic.version = 11 : i64} {
  func.func @rits_kernel(%arg0: memref<8x2x4xf32, #tpu.memory_space<vmem>>, %arg1: memref<8x2x4xf32, #tpu.memory_space<vmem>>, %arg2: memref<8x2x4xf32, #tpu.memory_space<vmem>>, %arg3: memref<8x2x32xf32, #tpu.memory_space<vmem>>, %arg4: memref<8x2x4xf32, #tpu.memory_space<vmem>>, %arg5: memref<8x2x128xf32, #tpu.memory_space<vmem>>, %arg6: memref<32x4xf32, #tpu.memory_space<vmem>>, %arg7: memref<1x4xf32, #tpu.memory_space<vmem>>, %arg8: memref<4x4xf32, #tpu.memory_space<vmem>>, %arg9: memref<1x4xf32, #tpu.memory_space<vmem>>, %arg10: memref<4x128xf32, #tpu.memory_space<vmem>>, %arg11: memref<32x128xf32, #tpu.memory_space<vmem>>, %arg12: memref<1x1xf32, #tpu.memory_space<vmem>>, %arg13: memref<8x2x4xf32, #tpu.memory_space<vmem>>) attributes {dimension_semantics = [], scalar_prefetch = 0 : i64, scratch_operands = 0 : i64, tpu.core_type = #tpu.core_type<tc>} {
    %c0 = arith.constant 0 : index
    %c0_0 = arith.constant 0 : index
    %0 = vector.load %arg6[%c0, %c0_0] : memref<32x4xf32, #tpu.memory_space<vmem>>, vector<32x4xf32>
    %c0_1 = arith.constant 0 : index
    %c0_2 = arith.constant 0 : index
    %1 = vector.load %arg7[%c0_1, %c0_2] : memref<1x4xf32, #tpu.memory_space<vmem>>, vector<1x4xf32>
    %c0_3 = arith.constant 0 : index
    %c0_4 = arith.constant 0 : index
    %2 = vector.load %arg8[%c0_3, %c0_4] : memref<4x4xf32, #tpu.memory_space<vmem>>, vector<4x4xf32>
    %c0_5 = arith.constant 0 : index
    %c0_6 = arith.constant 0 : index
    %3 = vector.load %arg9[%c0_5, %c0_6] : memref<1x4xf32, #tpu.memory_space<vmem>>, vector<1x4xf32>
    %c0_7 = arith.constant 0 : index
    %c0_8 = arith.constant 0 : index
    %4 = vector.load %arg10[%c0_7, %c0_8] : memref<4x128xf32, #tpu.memory_space<vmem>>, vector<4x128xf32>
    %c0_9 = arith.constant 0 : index
    %c0_10 = arith.constant 0 : index
    %5 = vector.load %arg11[%c0_9, %c0_10] : memref<32x128xf32, #tpu.memory_space<vmem>>, vector<32x128xf32>
    %cst = arith.constant 0.000000e+00 : f32
    %6 = vector.broadcast %cst : f32 to vector<2x32xf32>
    %cst_11 = arith.constant 0.000000e+00 : f32
    %7 = vector.broadcast %cst_11 : f32 to vector<2x32xf32>
    %cst_12 = arith.constant 0.000000e+00 : f32
    %8 = vector.broadcast %cst_12 : f32 to vector<1x1xf32>
    %c0_i32 = arith.constant 0 : i32
    %9 = arith.index_cast %c0_i32 : i32 to index
    %c0_13 = arith.constant 0 : index
    %c0_14 = arith.constant 0 : index
    %10 = vector.load %arg0[%9, %c0_13, %c0_14] : memref<8x2x4xf32, #tpu.memory_space<vmem>>, vector<1x2x4xf32>
    %11 = vector.shape_cast %10 : vector<1x2x4xf32> to vector<2x4xf32>
    %12 = arith.index_cast %c0_i32 : i32 to index
    %c0_15 = arith.constant 0 : index
    %c0_16 = arith.constant 0 : index
    %13 = vector.load %arg1[%12, %c0_15, %c0_16] : memref<8x2x4xf32, #tpu.memory_space<vmem>>, vector<1x2x4xf32>
    %14 = vector.shape_cast %13 : vector<1x2x4xf32> to vector<2x4xf32>
    %15 = arith.index_cast %c0_i32 : i32 to index
    %c0_17 = arith.constant 0 : index
    %c0_18 = arith.constant 0 : index
    %16 = vector.load %arg2[%15, %c0_17, %c0_18] : memref<8x2x4xf32, #tpu.memory_space<vmem>>, vector<1x2x4xf32>
    %17 = vector.shape_cast %16 : vector<1x2x4xf32> to vector<2x4xf32>
    %18 = arith.index_cast %c0_i32 : i32 to index
    %c0_19 = arith.constant 0 : index
    %c0_20 = arith.constant 0 : index
    %19 = vector.load %arg4[%18, %c0_19, %c0_20] : memref<8x2x4xf32, #tpu.memory_space<vmem>>, vector<1x2x4xf32>
    %20 = vector.shape_cast %19 : vector<1x2x4xf32> to vector<2x4xf32>
    %21 = arith.index_cast %c0_i32 : i32 to index
    %c0_21 = arith.constant 0 : index
    %c0_22 = arith.constant 0 : index
    %22 = vector.load %arg3[%21, %c0_21, %c0_22] : memref<8x2x32xf32, #tpu.memory_space<vmem>>, vector<1x2x32xf32>
    %23 = vector.shape_cast %22 : vector<1x2x32xf32> to vector<2x32xf32>
    %24 = arith.mulf %6, %23 : vector<2x32xf32>
    %cst_23 = arith.constant dense<0.000000e+00> : vector<2x4xf32>
    %25 = tpu.matmul %24, %0, %cst_23 {dimension_numbers = #tpu.dot_dimension_numbers<[1], [0], [0], [1], [0, 0, 1, 1], [], []>} : vector<2x32xf32>, vector<32x4xf32>, vector<2x4xf32> -> vector<2x4xf32>
    %26 = vector.broadcast %1 : vector<1x4xf32> to vector<2x4xf32>
    %27 = arith.addf %25, %26 : vector<2x4xf32>
    %28 = arith.mulf %14, %11 : vector<2x4xf32>
    %cst_24 = arith.constant 1.000000e+00 : f32
    %29 = vector.broadcast %cst_24 : f32 to vector<2x4xf32>
    %30 = arith.subf %29, %14 : vector<2x4xf32>
    %31 = arith.mulf %30, %27 : vector<2x4xf32>
    %32 = arith.addf %28, %31 : vector<2x4xf32>
    %cst_25 = arith.constant dense<0.000000e+00> : vector<2x4xf32>
    %33 = tpu.matmul %32, %2, %cst_25 {dimension_numbers = #tpu.dot_dimension_numbers<[1], [0], [0], [1], [0, 0, 1, 1], [], []>} : vector<2x4xf32>, vector<4x4xf32>, vector<2x4xf32> -> vector<2x4xf32>
    %34 = vector.broadcast %3 : vector<1x4xf32> to vector<2x4xf32>
    %35 = arith.addf %33, %34 : vector<2x4xf32>
    %36 = arith.mulf %20, %35 : vector<2x4xf32>
    %cst_26 = arith.constant 1.000000e+00 : f32
    %37 = vector.broadcast %cst_26 : f32 to vector<2x4xf32>
    %38 = arith.subf %37, %20 : vector<2x4xf32>
    %39 = arith.mulf %38, %27 : vector<2x4xf32>
    %40 = arith.addf %36, %39 : vector<2x4xf32>
    %41 = arith.subf %11, %27 : vector<2x4xf32>
    %42 = math.absf %41 : vector<2x4xf32>
    %43 = arith.subf %11, %35 : vector<2x4xf32>
    %44 = math.absf %43 : vector<2x4xf32>
    %45 = arith.addf %42, %44 : vector<2x4xf32>
    %46 = arith.subf %11, %40 : vector<2x4xf32>
    %47 = math.absf %46 : vector<2x4xf32>
    %48 = arith.addf %45, %47 : vector<2x4xf32>
    %49 = arith.mulf %48, %17 : vector<2x4xf32>
    %50 = vector.shape_cast %49 : vector<2x4xf32> to vector<1x2x4xf32>
    %cst_27 = arith.constant dense<0.000000e+00> : vector<1xf32>
    %51 = vector.multi_reduction <add>, %50, %cst_27 [1, 2] : vector<1x2x4xf32> to vector<1xf32>
    %52 = vector.shape_cast %51 : vector<1xf32> to vector<1x1x1xf32>
    %53 = vector.extract %52[0, 0, 0] : f32 from vector<1x1x1xf32>
    %54 = vector.broadcast %53 : f32 to vector<1x1xf32>
    %55 = arith.addf %8, %54 : vector<1x1xf32>
    %56 = arith.mulf %14, %11 : vector<2x4xf32>
    %cst_28 = arith.constant 1.000000e+00 : f32
    %57 = vector.broadcast %cst_28 : f32 to vector<2x4xf32>
    %58 = arith.subf %57, %14 : vector<2x4xf32>
    %59 = arith.mulf %58, %40 : vector<2x4xf32>
    %60 = arith.addf %56, %59 : vector<2x4xf32>
    %61 = arith.index_cast %c0_i32 : i32 to index
    %c0_29 = arith.constant 0 : index
    %c0_30 = arith.constant 0 : index
    %62 = vector.load %arg13[%61, %c0_29, %c0_30] : memref<8x2x4xf32, #tpu.memory_space<vmem>>, vector<1x2x4xf32>
    %63 = vector.shape_cast %62 : vector<1x2x4xf32> to vector<2x4xf32>
    %64 = vector.shape_cast %60 : vector<2x4xf32> to vector<1x2x4xf32>
    tpu.vector_store %arg13[%61, %c0_29, %c0_30], %64 {strides = array<i32>} : memref<8x2x4xf32, #tpu.memory_space<vmem>>, vector<1x2x4xf32>,
    %cst_31 = arith.constant dense<0.000000e+00> : vector<2x128xf32>
    %65 = tpu.matmul %60, %4, %cst_31 {dimension_numbers = #tpu.dot_dimension_numbers<[1], [0], [0], [1], [0, 0, 1, 1], [], []>} : vector<2x4xf32>, vector<4x128xf32>, vector<2x128xf32> -> vector<2x128xf32>
    %cst_32 = arith.constant dense<0.000000e+00> : vector<2x128xf32>
    %66 = tpu.matmul %24, %5, %cst_32 {dimension_numbers = #tpu.dot_dimension_numbers<[1], [0], [0], [1], [0, 0, 1, 1], [], []>} : vector<2x32xf32>, vector<32x128xf32>, vector<2x128xf32> -> vector<2x128xf32>
    %67 = arith.addf %65, %66 : vector<2x128xf32>
    %68 = arith.index_cast %c0_i32 : i32 to index
    %c0_33 = arith.constant 0 : index
    %c0_34 = arith.constant 0 : index
    %69 = vector.load %arg5[%68, %c0_33, %c0_34] : memref<8x2x128xf32, #tpu.memory_space<vmem>>, vector<1x2x128xf32>
    %70 = vector.shape_cast %69 : vector<1x2x128xf32> to vector<2x128xf32>
    %71 = arith.addf %67, %70 : vector<2x128xf32>
    %72 = arith.negf %71 : vector<2x128xf32>
    %73 = math.exp %72 : vector<2x128xf32>
    %cst_35 = arith.constant 1.000000e+00 : f32
    %74 = vector.broadcast %cst_35 : f32 to vector<2x128xf32>
    %75 = arith.addf %74, %73 : vector<2x128xf32>
    %76 = arith.divf %74, %75 : vector<2x128xf32>
    %77 = math.tanh %71 : vector<2x128xf32>
    %78 = vector.extract_strided_slice %76 {offsets = [0, 0], sizes = [2, 32], strides = [1, 1]} : vector<2x128xf32> to vector<2x32xf32>
    %79 = vector.extract_strided_slice %76 {offsets = [0, 32], sizes = [2, 32], strides = [1, 1]} : vector<2x128xf32> to vector<2x32xf32>
    %80 = vector.extract_strided_slice %77 {offsets = [0, 64], sizes = [2, 32], strides = [1, 1]} : vector<2x128xf32> to vector<2x32xf32>
    %81 = vector.extract_strided_slice %76 {offsets = [0, 96], sizes = [2, 32], strides = [1, 1]} : vector<2x128xf32> to vector<2x32xf32>
    %82 = arith.mulf %79, %7 : vector<2x32xf32>
    %83 = arith.mulf %78, %80 : vector<2x32xf32>
    %84 = arith.addf %82, %83 : vector<2x32xf32>
    %85 = math.tanh %84 : vector<2x32xf32>
    %86 = arith.mulf %81, %85 : vector<2x32xf32>
    %c1_i32 = arith.constant 1 : i32
    %87 = arith.index_cast %c1_i32 : i32 to index
    %c0_36 = arith.constant 0 : index
    %c0_37 = arith.constant 0 : index
    %88 = vector.load %arg0[%87, %c0_36, %c0_37] : memref<8x2x4xf32, #tpu.memory_space<vmem>>, vector<1x2x4xf32>
    %89 = vector.shape_cast %88 : vector<1x2x4xf32> to vector<2x4xf32>
    %90 = arith.index_cast %c1_i32 : i32 to index
    %c0_38 = arith.constant 0 : index
    %c0_39 = arith.constant 0 : index
    %91 = vector.load %arg1[%90, %c0_38, %c0_39] : memref<8x2x4xf32, #tpu.memory_space<vmem>>, vector<1x2x4xf32>
    %92 = vector.shape_cast %91 : vector<1x2x4xf32> to vector<2x4xf32>
    %93 = arith.index_cast %c1_i32 : i32 to index
    %c0_40 = arith.constant 0 : index
    %c0_41 = arith.constant 0 : index
    %94 = vector.load %arg2[%93, %c0_40, %c0_41] : memref<8x2x4xf32, #tpu.memory_space<vmem>>, vector<1x2x4xf32>
    %95 = vector.shape_cast %94 : vector<1x2x4xf32> to vector<2x4xf32>
    %96 = arith.index_cast %c1_i32 : i32 to index
    %c0_42 = arith.constant 0 : index
    %c0_43 = arith.constant 0 : index
    %97 = vector.load %arg4[%96, %c0_42, %c0_43] : memref<8x2x4xf32, #tpu.memory_space<vmem>>, vector<1x2x4xf32>
    %98 = vector.shape_cast %97 : vector<1x2x4xf32> to vector<2x4xf32>
    %99 = arith.index_cast %c1_i32 : i32 to index
    %c0_44 = arith.constant 0 : index
    %c0_45 = arith.constant 0 : index
    %100 = vector.load %arg3[%99, %c0_44, %c0_45] : memref<8x2x32xf32, #tpu.memory_space<vmem>>, vector<1x2x32xf32>
    %101 = vector.shape_cast %100 : vector<1x2x32xf32> to vector<2x32xf32>
    %102 = arith.mulf %86, %101 : vector<2x32xf32>
    %cst_46 = arith.constant dense<0.000000e+00> : vector<2x4xf32>
    %103 = tpu.matmul %102, %0, %cst_46 {dimension_numbers = #tpu.dot_dimension_numbers<[1], [0], [0], [1], [0, 0, 1, 1], [], []>} : vector<2x32xf32>, vector<32x4xf32>, vector<2x4xf32> -> vector<2x4xf32>
    %104 = vector.broadcast %1 : vector<1x4xf32> to vector<2x4xf32>
    %105 = arith.addf %103, %104 : vector<2x4xf32>
    %106 = arith.mulf %92, %89 : vector<2x4xf32>
    %cst_47 = arith.constant 1.000000e+00 : f32
    %107 = vector.broadcast %cst_47 : f32 to vector<2x4xf32>
    %108 = arith.subf %107, %92 : vector<2x4xf32>
    %109 = arith.mulf %108, %105 : vector<2x4xf32>
    %110 = arith.addf %106, %109 : vector<2x4xf32>
    %cst_48 = arith.constant dense<0.000000e+00> : vector<2x4xf32>
    %111 = tpu.matmul %110, %2, %cst_48 {dimension_numbers = #tpu.dot_dimension_numbers<[1], [0], [0], [1], [0, 0, 1, 1], [], []>} : vector<2x4xf32>, vector<4x4xf32>, vector<2x4xf32> -> vector<2x4xf32>
    %112 = vector.broadcast %3 : vector<1x4xf32> to vector<2x4xf32>
    %113 = arith.addf %111, %112 : vector<2x4xf32>
    %114 = arith.mulf %98, %113 : vector<2x4xf32>
    %cst_49 = arith.constant 1.000000e+00 : f32
    %115 = vector.broadcast %cst_49 : f32 to vector<2x4xf32>
    %116 = arith.subf %115, %98 : vector<2x4xf32>
    %117 = arith.mulf %116, %105 : vector<2x4xf32>
    %118 = arith.addf %114, %117 : vector<2x4xf32>
    %119 = arith.subf %89, %105 : vector<2x4xf32>
    %120 = math.absf %119 : vector<2x4xf32>
    %121 = arith.subf %89, %113 : vector<2x4xf32>
    %122 = math.absf %121 : vector<2x4xf32>
    %123 = arith.addf %120, %122 : vector<2x4xf32>
    %124 = arith.subf %89, %118 : vector<2x4xf32>
    %125 = math.absf %124 : vector<2x4xf32>
    %126 = arith.addf %123, %125 : vector<2x4xf32>
    %127 = arith.mulf %126, %95 : vector<2x4xf32>
    %128 = vector.shape_cast %127 : vector<2x4xf32> to vector<1x2x4xf32>
    %cst_50 = arith.constant dense<0.000000e+00> : vector<1xf32>
    %129 = vector.multi_reduction <add>, %128, %cst_50 [1, 2] : vector<1x2x4xf32> to vector<1xf32>
    %130 = vector.shape_cast %129 : vector<1xf32> to vector<1x1x1xf32>
    %131 = vector.extract %130[0, 0, 0] : f32 from vector<1x1x1xf32>
    %132 = vector.broadcast %131 : f32 to vector<1x1xf32>
    %133 = arith.addf %55, %132 : vector<1x1xf32>
    %134 = arith.mulf %92, %89 : vector<2x4xf32>
    %cst_51 = arith.constant 1.000000e+00 : f32
    %135 = vector.broadcast %cst_51 : f32 to vector<2x4xf32>
    %136 = arith.subf %135, %92 : vector<2x4xf32>
    %137 = arith.mulf %136, %118 : vector<2x4xf32>
    %138 = arith.addf %134, %137 : vector<2x4xf32>
    %139 = arith.index_cast %c1_i32 : i32 to index
    %c0_52 = arith.constant 0 : index
    %c0_53 = arith.constant 0 : index
    %140 = vector.load %arg13[%139, %c0_52, %c0_53] : memref<8x2x4xf32, #tpu.memory_space<vmem>>, vector<1x2x4xf32>
    %141 = vector.shape_cast %140 : vector<1x2x4xf32> to vector<2x4xf32>
    %142 = vector.shape_cast %138 : vector<2x4xf32> to vector<1x2x4xf32>
    tpu.vector_store %arg13[%139, %c0_52, %c0_53], %142 {strides = array<i32>} : memref<8x2x4xf32, #tpu.memory_space<vmem>>, vector<1x2x4xf32>,
    %cst_54 = arith.constant dense<0.000000e+00> : vector<2x128xf32>
    %143 = tpu.matmul %138, %4, %cst_54 {dimension_numbers = #tpu.dot_dimension_numbers<[1], [0], [0], [1], [0, 0, 1, 1], [], []>} : vector<2x4xf32>, vector<4x128xf32>, vector<2x128xf32> -> vector<2x128xf32>
    %cst_55 = arith.constant dense<0.000000e+00> : vector<2x128xf32>
    %144 = tpu.matmul %102, %5, %cst_55 {dimension_numbers = #tpu.dot_dimension_numbers<[1], [0], [0], [1], [0, 0, 1, 1], [], []>} : vector<2x32xf32>, vector<32x128xf32>, vector<2x128xf32> -> vector<2x128xf32>
    %145 = arith.addf %143, %144 : vector<2x128xf32>
    %146 = arith.index_cast %c1_i32 : i32 to index
    %c0_56 = arith.constant 0 : index
    %c0_57 = arith.constant 0 : index
    %147 = vector.load %arg5[%146, %c0_56, %c0_57] : memref<8x2x128xf32, #tpu.memory_space<vmem>>, vector<1x2x128xf32>
    %148 = vector.shape_cast %147 : vector<1x2x128xf32> to vector<2x128xf32>
    %149 = arith.addf %145, %148 : vector<2x128xf32>
    %150 = arith.negf %149 : vector<2x128xf32>
    %151 = math.exp %150 : vector<2x128xf32>
    %cst_58 = arith.constant 1.000000e+00 : f32
    %152 = vector.broadcast %cst_58 : f32 to vector<2x128xf32>
    %153 = arith.addf %152, %151 : vector<2x128xf32>
    %154 = arith.divf %152, %153 : vector<2x128xf32>
    %155 = math.tanh %149 : vector<2x128xf32>
    %156 = vector.extract_strided_slice %154 {offsets = [0, 0], sizes = [2, 32], strides = [1, 1]} : vector<2x128xf32> to vector<2x32xf32>
    %157 = vector.extract_strided_slice %154 {offsets = [0, 32], sizes = [2, 32], strides = [1, 1]} : vector<2x128xf32> to vector<2x32xf32>
    %158 = vector.extract_strided_slice %155 {offsets = [0, 64], sizes = [2, 32], strides = [1, 1]} : vector<2x128xf32> to vector<2x32xf32>
    %159 = vector.extract_strided_slice %154 {offsets = [0, 96], sizes = [2, 32], strides = [1, 1]} : vector<2x128xf32> to vector<2x32xf32>
    %160 = arith.mulf %157, %84 : vector<2x32xf32>
    %161 = arith.mulf %156, %158 : vector<2x32xf32>
    %162 = arith.addf %160, %161 : vector<2x32xf32>
    %163 = math.tanh %162 : vector<2x32xf32>
    %164 = arith.mulf %159, %163 : vector<2x32xf32>
    %c2_i32 = arith.constant 2 : i32
    %165 = arith.index_cast %c2_i32 : i32 to index
    %c0_59 = arith.constant 0 : index
    %c0_60 = arith.constant 0 : index
    %166 = vector.load %arg0[%165, %c0_59, %c0_60] : memref<8x2x4xf32, #tpu.memory_space<vmem>>, vector<1x2x4xf32>
    %167 = vector.shape_cast %166 : vector<1x2x4xf32> to vector<2x4xf32>
    %168 = arith.index_cast %c2_i32 : i32 to index
    %c0_61 = arith.constant 0 : index
    %c0_62 = arith.constant 0 : index
    %169 = vector.load %arg1[%168, %c0_61, %c0_62] : memref<8x2x4xf32, #tpu.memory_space<vmem>>, vector<1x2x4xf32>
    %170 = vector.shape_cast %169 : vector<1x2x4xf32> to vector<2x4xf32>
    %171 = arith.index_cast %c2_i32 : i32 to index
    %c0_63 = arith.constant 0 : index
    %c0_64 = arith.constant 0 : index
    %172 = vector.load %arg2[%171, %c0_63, %c0_64] : memref<8x2x4xf32, #tpu.memory_space<vmem>>, vector<1x2x4xf32>
    %173 = vector.shape_cast %172 : vector<1x2x4xf32> to vector<2x4xf32>
    %174 = arith.index_cast %c2_i32 : i32 to index
    %c0_65 = arith.constant 0 : index
    %c0_66 = arith.constant 0 : index
    %175 = vector.load %arg4[%174, %c0_65, %c0_66] : memref<8x2x4xf32, #tpu.memory_space<vmem>>, vector<1x2x4xf32>
    %176 = vector.shape_cast %175 : vector<1x2x4xf32> to vector<2x4xf32>
    %177 = arith.index_cast %c2_i32 : i32 to index
    %c0_67 = arith.constant 0 : index
    %c0_68 = arith.constant 0 : index
    %178 = vector.load %arg3[%177, %c0_67, %c0_68] : memref<8x2x32xf32, #tpu.memory_space<vmem>>, vector<1x2x32xf32>
    %179 = vector.shape_cast %178 : vector<1x2x32xf32> to vector<2x32xf32>
    %180 = arith.mulf %164, %179 : vector<2x32xf32>
    %cst_69 = arith.constant dense<0.000000e+00> : vector<2x4xf32>
    %181 = tpu.matmul %180, %0, %cst_69 {dimension_numbers = #tpu.dot_dimension_numbers<[1], [0], [0], [1], [0, 0, 1, 1], [], []>} : vector<2x32xf32>, vector<32x4xf32>, vector<2x4xf32> -> vector<2x4xf32>
    %182 = vector.broadcast %1 : vector<1x4xf32> to vector<2x4xf32>
    %183 = arith.addf %181, %182 : vector<2x4xf32>
    %184 = arith.mulf %170, %167 : vector<2x4xf32>
    %cst_70 = arith.constant 1.000000e+00 : f32
    %185 = vector.broadcast %cst_70 : f32 to vector<2x4xf32>
    %186 = arith.subf %185, %170 : vector<2x4xf32>
    %187 = arith.mulf %186, %183 : vector<2x4xf32>
    %188 = arith.addf %184, %187 : vector<2x4xf32>
    %cst_71 = arith.constant dense<0.000000e+00> : vector<2x4xf32>
    %189 = tpu.matmul %188, %2, %cst_71 {dimension_numbers = #tpu.dot_dimension_numbers<[1], [0], [0], [1], [0, 0, 1, 1], [], []>} : vector<2x4xf32>, vector<4x4xf32>, vector<2x4xf32> -> vector<2x4xf32>
    %190 = vector.broadcast %3 : vector<1x4xf32> to vector<2x4xf32>
    %191 = arith.addf %189, %190 : vector<2x4xf32>
    %192 = arith.mulf %176, %191 : vector<2x4xf32>
    %cst_72 = arith.constant 1.000000e+00 : f32
    %193 = vector.broadcast %cst_72 : f32 to vector<2x4xf32>
    %194 = arith.subf %193, %176 : vector<2x4xf32>
    %195 = arith.mulf %194, %183 : vector<2x4xf32>
    %196 = arith.addf %192, %195 : vector<2x4xf32>
    %197 = arith.subf %167, %183 : vector<2x4xf32>
    %198 = math.absf %197 : vector<2x4xf32>
    %199 = arith.subf %167, %191 : vector<2x4xf32>
    %200 = math.absf %199 : vector<2x4xf32>
    %201 = arith.addf %198, %200 : vector<2x4xf32>
    %202 = arith.subf %167, %196 : vector<2x4xf32>
    %203 = math.absf %202 : vector<2x4xf32>
    %204 = arith.addf %201, %203 : vector<2x4xf32>
    %205 = arith.mulf %204, %173 : vector<2x4xf32>
    %206 = vector.shape_cast %205 : vector<2x4xf32> to vector<1x2x4xf32>
    %cst_73 = arith.constant dense<0.000000e+00> : vector<1xf32>
    %207 = vector.multi_reduction <add>, %206, %cst_73 [1, 2] : vector<1x2x4xf32> to vector<1xf32>
    %208 = vector.shape_cast %207 : vector<1xf32> to vector<1x1x1xf32>
    %209 = vector.extract %208[0, 0, 0] : f32 from vector<1x1x1xf32>
    %210 = vector.broadcast %209 : f32 to vector<1x1xf32>
    %211 = arith.addf %133, %210 : vector<1x1xf32>
    %212 = arith.mulf %170, %167 : vector<2x4xf32>
    %cst_74 = arith.constant 1.000000e+00 : f32
    %213 = vector.broadcast %cst_74 : f32 to vector<2x4xf32>
    %214 = arith.subf %213, %170 : vector<2x4xf32>
    %215 = arith.mulf %214, %196 : vector<2x4xf32>
    %216 = arith.addf %212, %215 : vector<2x4xf32>
    %217 = arith.index_cast %c2_i32 : i32 to index
    %c0_75 = arith.constant 0 : index
    %c0_76 = arith.constant 0 : index
    %218 = vector.load %arg13[%217, %c0_75, %c0_76] : memref<8x2x4xf32, #tpu.memory_space<vmem>>, vector<1x2x4xf32>
    %219 = vector.shape_cast %218 : vector<1x2x4xf32> to vector<2x4xf32>
    %220 = vector.shape_cast %216 : vector<2x4xf32> to vector<1x2x4xf32>
    tpu.vector_store %arg13[%217, %c0_75, %c0_76], %220 {strides = array<i32>} : memref<8x2x4xf32, #tpu.memory_space<vmem>>, vector<1x2x4xf32>,
    %cst_77 = arith.constant dense<0.000000e+00> : vector<2x128xf32>
    %221 = tpu.matmul %216, %4, %cst_77 {dimension_numbers = #tpu.dot_dimension_numbers<[1], [0], [0], [1], [0, 0, 1, 1], [], []>} : vector<2x4xf32>, vector<4x128xf32>, vector<2x128xf32> -> vector<2x128xf32>
    %cst_78 = arith.constant dense<0.000000e+00> : vector<2x128xf32>
    %222 = tpu.matmul %180, %5, %cst_78 {dimension_numbers = #tpu.dot_dimension_numbers<[1], [0], [0], [1], [0, 0, 1, 1], [], []>} : vector<2x32xf32>, vector<32x128xf32>, vector<2x128xf32> -> vector<2x128xf32>
    %223 = arith.addf %221, %222 : vector<2x128xf32>
    %224 = arith.index_cast %c2_i32 : i32 to index
    %c0_79 = arith.constant 0 : index
    %c0_80 = arith.constant 0 : index
    %225 = vector.load %arg5[%224, %c0_79, %c0_80] : memref<8x2x128xf32, #tpu.memory_space<vmem>>, vector<1x2x128xf32>
    %226 = vector.shape_cast %225 : vector<1x2x128xf32> to vector<2x128xf32>
    %227 = arith.addf %223, %226 : vector<2x128xf32>
    %228 = arith.negf %227 : vector<2x128xf32>
    %229 = math.exp %228 : vector<2x128xf32>
    %cst_81 = arith.constant 1.000000e+00 : f32
    %230 = vector.broadcast %cst_81 : f32 to vector<2x128xf32>
    %231 = arith.addf %230, %229 : vector<2x128xf32>
    %232 = arith.divf %230, %231 : vector<2x128xf32>
    %233 = math.tanh %227 : vector<2x128xf32>
    %234 = vector.extract_strided_slice %232 {offsets = [0, 0], sizes = [2, 32], strides = [1, 1]} : vector<2x128xf32> to vector<2x32xf32>
    %235 = vector.extract_strided_slice %232 {offsets = [0, 32], sizes = [2, 32], strides = [1, 1]} : vector<2x128xf32> to vector<2x32xf32>
    %236 = vector.extract_strided_slice %233 {offsets = [0, 64], sizes = [2, 32], strides = [1, 1]} : vector<2x128xf32> to vector<2x32xf32>
    %237 = vector.extract_strided_slice %232 {offsets = [0, 96], sizes = [2, 32], strides = [1, 1]} : vector<2x128xf32> to vector<2x32xf32>
    %238 = arith.mulf %235, %162 : vector<2x32xf32>
    %239 = arith.mulf %234, %236 : vector<2x32xf32>
    %240 = arith.addf %238, %239 : vector<2x32xf32>
    %241 = math.tanh %240 : vector<2x32xf32>
    %242 = arith.mulf %237, %241 : vector<2x32xf32>
    %c3_i32 = arith.constant 3 : i32
    %243 = arith.index_cast %c3_i32 : i32 to index
    %c0_82 = arith.constant 0 : index
    %c0_83 = arith.constant 0 : index
    %244 = vector.load %arg0[%243, %c0_82, %c0_83] : memref<8x2x4xf32, #tpu.memory_space<vmem>>, vector<1x2x4xf32>
    %245 = vector.shape_cast %244 : vector<1x2x4xf32> to vector<2x4xf32>
    %246 = arith.index_cast %c3_i32 : i32 to index
    %c0_84 = arith.constant 0 : index
    %c0_85 = arith.constant 0 : index
    %247 = vector.load %arg1[%246, %c0_84, %c0_85] : memref<8x2x4xf32, #tpu.memory_space<vmem>>, vector<1x2x4xf32>
    %248 = vector.shape_cast %247 : vector<1x2x4xf32> to vector<2x4xf32>
    %249 = arith.index_cast %c3_i32 : i32 to index
    %c0_86 = arith.constant 0 : index
    %c0_87 = arith.constant 0 : index
    %250 = vector.load %arg2[%249, %c0_86, %c0_87] : memref<8x2x4xf32, #tpu.memory_space<vmem>>, vector<1x2x4xf32>
    %251 = vector.shape_cast %250 : vector<1x2x4xf32> to vector<2x4xf32>
    %252 = arith.index_cast %c3_i32 : i32 to index
    %c0_88 = arith.constant 0 : index
    %c0_89 = arith.constant 0 : index
    %253 = vector.load %arg4[%252, %c0_88, %c0_89] : memref<8x2x4xf32, #tpu.memory_space<vmem>>, vector<1x2x4xf32>
    %254 = vector.shape_cast %253 : vector<1x2x4xf32> to vector<2x4xf32>
    %255 = arith.index_cast %c3_i32 : i32 to index
    %c0_90 = arith.constant 0 : index
    %c0_91 = arith.constant 0 : index
    %256 = vector.load %arg3[%255, %c0_90, %c0_91] : memref<8x2x32xf32, #tpu.memory_space<vmem>>, vector<1x2x32xf32>
    %257 = vector.shape_cast %256 : vector<1x2x32xf32> to vector<2x32xf32>
    %258 = arith.mulf %242, %257 : vector<2x32xf32>
    %cst_92 = arith.constant dense<0.000000e+00> : vector<2x4xf32>
    %259 = tpu.matmul %258, %0, %cst_92 {dimension_numbers = #tpu.dot_dimension_numbers<[1], [0], [0], [1], [0, 0, 1, 1], [], []>} : vector<2x32xf32>, vector<32x4xf32>, vector<2x4xf32> -> vector<2x4xf32>
    %260 = vector.broadcast %1 : vector<1x4xf32> to vector<2x4xf32>
    %261 = arith.addf %259, %260 : vector<2x4xf32>
    %262 = arith.mulf %248, %245 : vector<2x4xf32>
    %cst_93 = arith.constant 1.000000e+00 : f32
    %263 = vector.broadcast %cst_93 : f32 to vector<2x4xf32>
    %264 = arith.subf %263, %248 : vector<2x4xf32>
    %265 = arith.mulf %264, %261 : vector<2x4xf32>
    %266 = arith.addf %262, %265 : vector<2x4xf32>
    %cst_94 = arith.constant dense<0.000000e+00> : vector<2x4xf32>
    %267 = tpu.matmul %266, %2, %cst_94 {dimension_numbers = #tpu.dot_dimension_numbers<[1], [0], [0], [1], [0, 0, 1, 1], [], []>} : vector<2x4xf32>, vector<4x4xf32>, vector<2x4xf32> -> vector<2x4xf32>
    %268 = vector.broadcast %3 : vector<1x4xf32> to vector<2x4xf32>
    %269 = arith.addf %267, %268 : vector<2x4xf32>
    %270 = arith.mulf %254, %269 : vector<2x4xf32>
    %cst_95 = arith.constant 1.000000e+00 : f32
    %271 = vector.broadcast %cst_95 : f32 to vector<2x4xf32>
    %272 = arith.subf %271, %254 : vector<2x4xf32>
    %273 = arith.mulf %272, %261 : vector<2x4xf32>
    %274 = arith.addf %270, %273 : vector<2x4xf32>
    %275 = arith.subf %245, %261 : vector<2x4xf32>
    %276 = math.absf %275 : vector<2x4xf32>
    %277 = arith.subf %245, %269 : vector<2x4xf32>
    %278 = math.absf %277 : vector<2x4xf32>
    %279 = arith.addf %276, %278 : vector<2x4xf32>
    %280 = arith.subf %245, %274 : vector<2x4xf32>
    %281 = math.absf %280 : vector<2x4xf32>
    %282 = arith.addf %279, %281 : vector<2x4xf32>
    %283 = arith.mulf %282, %251 : vector<2x4xf32>
    %284 = vector.shape_cast %283 : vector<2x4xf32> to vector<1x2x4xf32>
    %cst_96 = arith.constant dense<0.000000e+00> : vector<1xf32>
    %285 = vector.multi_reduction <add>, %284, %cst_96 [1, 2] : vector<1x2x4xf32> to vector<1xf32>
    %286 = vector.shape_cast %285 : vector<1xf32> to vector<1x1x1xf32>
    %287 = vector.extract %286[0, 0, 0] : f32 from vector<1x1x1xf32>
    %288 = vector.broadcast %287 : f32 to vector<1x1xf32>
    %289 = arith.addf %211, %288 : vector<1x1xf32>
    %290 = arith.mulf %248, %245 : vector<2x4xf32>
    %cst_97 = arith.constant 1.000000e+00 : f32
    %291 = vector.broadcast %cst_97 : f32 to vector<2x4xf32>
    %292 = arith.subf %291, %248 : vector<2x4xf32>
    %293 = arith.mulf %292, %274 : vector<2x4xf32>
    %294 = arith.addf %290, %293 : vector<2x4xf32>
    %295 = arith.index_cast %c3_i32 : i32 to index
    %c0_98 = arith.constant 0 : index
    %c0_99 = arith.constant 0 : index
    %296 = vector.load %arg13[%295, %c0_98, %c0_99] : memref<8x2x4xf32, #tpu.memory_space<vmem>>, vector<1x2x4xf32>
    %297 = vector.shape_cast %296 : vector<1x2x4xf32> to vector<2x4xf32>
    %298 = vector.shape_cast %294 : vector<2x4xf32> to vector<1x2x4xf32>
    tpu.vector_store %arg13[%295, %c0_98, %c0_99], %298 {strides = array<i32>} : memref<8x2x4xf32, #tpu.memory_space<vmem>>, vector<1x2x4xf32>,
    %cst_100 = arith.constant dense<0.000000e+00> : vector<2x128xf32>
    %299 = tpu.matmul %294, %4, %cst_100 {dimension_numbers = #tpu.dot_dimension_numbers<[1], [0], [0], [1], [0, 0, 1, 1], [], []>} : vector<2x4xf32>, vector<4x128xf32>, vector<2x128xf32> -> vector<2x128xf32>
    %cst_101 = arith.constant dense<0.000000e+00> : vector<2x128xf32>
    %300 = tpu.matmul %258, %5, %cst_101 {dimension_numbers = #tpu.dot_dimension_numbers<[1], [0], [0], [1], [0, 0, 1, 1], [], []>} : vector<2x32xf32>, vector<32x128xf32>, vector<2x128xf32> -> vector<2x128xf32>
    %301 = arith.addf %299, %300 : vector<2x128xf32>
    %302 = arith.index_cast %c3_i32 : i32 to index
    %c0_102 = arith.constant 0 : index
    %c0_103 = arith.constant 0 : index
    %303 = vector.load %arg5[%302, %c0_102, %c0_103] : memref<8x2x128xf32, #tpu.memory_space<vmem>>, vector<1x2x128xf32>
    %304 = vector.shape_cast %303 : vector<1x2x128xf32> to vector<2x128xf32>
    %305 = arith.addf %301, %304 : vector<2x128xf32>
    %306 = arith.negf %305 : vector<2x128xf32>
    %307 = math.exp %306 : vector<2x128xf32>
    %cst_104 = arith.constant 1.000000e+00 : f32
    %308 = vector.broadcast %cst_104 : f32 to vector<2x128xf32>
    %309 = arith.addf %308, %307 : vector<2x128xf32>
    %310 = arith.divf %308, %309 : vector<2x128xf32>
    %311 = math.tanh %305 : vector<2x128xf32>
    %312 = vector.extract_strided_slice %310 {offsets = [0, 0], sizes = [2, 32], strides = [1, 1]} : vector<2x128xf32> to vector<2x32xf32>
    %313 = vector.extract_strided_slice %310 {offsets = [0, 32], sizes = [2, 32], strides = [1, 1]} : vector<2x128xf32> to vector<2x32xf32>
    %314 = vector.extract_strided_slice %311 {offsets = [0, 64], sizes = [2, 32], strides = [1, 1]} : vector<2x128xf32> to vector<2x32xf32>
    %315 = vector.extract_strided_slice %310 {offsets = [0, 96], sizes = [2, 32], strides = [1, 1]} : vector<2x128xf32> to vector<2x32xf32>
    %316 = arith.mulf %313, %240 : vector<2x32xf32>
    %317 = arith.mulf %312, %314 : vector<2x32xf32>
    %318 = arith.addf %316, %317 : vector<2x32xf32>
    %319 = math.tanh %318 : vector<2x32xf32>
    %320 = arith.mulf %315, %319 : vector<2x32xf32>
    %c4_i32 = arith.constant 4 : i32
    %321 = arith.index_cast %c4_i32 : i32 to index
    %c0_105 = arith.constant 0 : index
    %c0_106 = arith.constant 0 : index
    %322 = vector.load %arg0[%321, %c0_105, %c0_106] : memref<8x2x4xf32, #tpu.memory_space<vmem>>, vector<1x2x4xf32>
    %323 = vector.shape_cast %322 : vector<1x2x4xf32> to vector<2x4xf32>
    %324 = arith.index_cast %c4_i32 : i32 to index
    %c0_107 = arith.constant 0 : index
    %c0_108 = arith.constant 0 : index
    %325 = vector.load %arg1[%324, %c0_107, %c0_108] : memref<8x2x4xf32, #tpu.memory_space<vmem>>, vector<1x2x4xf32>
    %326 = vector.shape_cast %325 : vector<1x2x4xf32> to vector<2x4xf32>
    %327 = arith.index_cast %c4_i32 : i32 to index
    %c0_109 = arith.constant 0 : index
    %c0_110 = arith.constant 0 : index
    %328 = vector.load %arg2[%327, %c0_109, %c0_110] : memref<8x2x4xf32, #tpu.memory_space<vmem>>, vector<1x2x4xf32>
    %329 = vector.shape_cast %328 : vector<1x2x4xf32> to vector<2x4xf32>
    %330 = arith.index_cast %c4_i32 : i32 to index
    %c0_111 = arith.constant 0 : index
    %c0_112 = arith.constant 0 : index
    %331 = vector.load %arg4[%330, %c0_111, %c0_112] : memref<8x2x4xf32, #tpu.memory_space<vmem>>, vector<1x2x4xf32>
    %332 = vector.shape_cast %331 : vector<1x2x4xf32> to vector<2x4xf32>
    %333 = arith.index_cast %c4_i32 : i32 to index
    %c0_113 = arith.constant 0 : index
    %c0_114 = arith.constant 0 : index
    %334 = vector.load %arg3[%333, %c0_113, %c0_114] : memref<8x2x32xf32, #tpu.memory_space<vmem>>, vector<1x2x32xf32>
    %335 = vector.shape_cast %334 : vector<1x2x32xf32> to vector<2x32xf32>
    %336 = arith.mulf %320, %335 : vector<2x32xf32>
    %cst_115 = arith.constant dense<0.000000e+00> : vector<2x4xf32>
    %337 = tpu.matmul %336, %0, %cst_115 {dimension_numbers = #tpu.dot_dimension_numbers<[1], [0], [0], [1], [0, 0, 1, 1], [], []>} : vector<2x32xf32>, vector<32x4xf32>, vector<2x4xf32> -> vector<2x4xf32>
    %338 = vector.broadcast %1 : vector<1x4xf32> to vector<2x4xf32>
    %339 = arith.addf %337, %338 : vector<2x4xf32>
    %340 = arith.mulf %326, %323 : vector<2x4xf32>
    %cst_116 = arith.constant 1.000000e+00 : f32
    %341 = vector.broadcast %cst_116 : f32 to vector<2x4xf32>
    %342 = arith.subf %341, %326 : vector<2x4xf32>
    %343 = arith.mulf %342, %339 : vector<2x4xf32>
    %344 = arith.addf %340, %343 : vector<2x4xf32>
    %cst_117 = arith.constant dense<0.000000e+00> : vector<2x4xf32>
    %345 = tpu.matmul %344, %2, %cst_117 {dimension_numbers = #tpu.dot_dimension_numbers<[1], [0], [0], [1], [0, 0, 1, 1], [], []>} : vector<2x4xf32>, vector<4x4xf32>, vector<2x4xf32> -> vector<2x4xf32>
    %346 = vector.broadcast %3 : vector<1x4xf32> to vector<2x4xf32>
    %347 = arith.addf %345, %346 : vector<2x4xf32>
    %348 = arith.mulf %332, %347 : vector<2x4xf32>
    %cst_118 = arith.constant 1.000000e+00 : f32
    %349 = vector.broadcast %cst_118 : f32 to vector<2x4xf32>
    %350 = arith.subf %349, %332 : vector<2x4xf32>
    %351 = arith.mulf %350, %339 : vector<2x4xf32>
    %352 = arith.addf %348, %351 : vector<2x4xf32>
    %353 = arith.subf %323, %339 : vector<2x4xf32>
    %354 = math.absf %353 : vector<2x4xf32>
    %355 = arith.subf %323, %347 : vector<2x4xf32>
    %356 = math.absf %355 : vector<2x4xf32>
    %357 = arith.addf %354, %356 : vector<2x4xf32>
    %358 = arith.subf %323, %352 : vector<2x4xf32>
    %359 = math.absf %358 : vector<2x4xf32>
    %360 = arith.addf %357, %359 : vector<2x4xf32>
    %361 = arith.mulf %360, %329 : vector<2x4xf32>
    %362 = vector.shape_cast %361 : vector<2x4xf32> to vector<1x2x4xf32>
    %cst_119 = arith.constant dense<0.000000e+00> : vector<1xf32>
    %363 = vector.multi_reduction <add>, %362, %cst_119 [1, 2] : vector<1x2x4xf32> to vector<1xf32>
    %364 = vector.shape_cast %363 : vector<1xf32> to vector<1x1x1xf32>
    %365 = vector.extract %364[0, 0, 0] : f32 from vector<1x1x1xf32>
    %366 = vector.broadcast %365 : f32 to vector<1x1xf32>
    %367 = arith.addf %289, %366 : vector<1x1xf32>
    %368 = arith.mulf %326, %323 : vector<2x4xf32>
    %cst_120 = arith.constant 1.000000e+00 : f32
    %369 = vector.broadcast %cst_120 : f32 to vector<2x4xf32>
    %370 = arith.subf %369, %326 : vector<2x4xf32>
    %371 = arith.mulf %370, %352 : vector<2x4xf32>
    %372 = arith.addf %368, %371 : vector<2x4xf32>
    %373 = arith.index_cast %c4_i32 : i32 to index
    %c0_121 = arith.constant 0 : index
    %c0_122 = arith.constant 0 : index
    %374 = vector.load %arg13[%373, %c0_121, %c0_122] : memref<8x2x4xf32, #tpu.memory_space<vmem>>, vector<1x2x4xf32>
    %375 = vector.shape_cast %374 : vector<1x2x4xf32> to vector<2x4xf32>
    %376 = vector.shape_cast %372 : vector<2x4xf32> to vector<1x2x4xf32>
    tpu.vector_store %arg13[%373, %c0_121, %c0_122], %376 {strides = array<i32>} : memref<8x2x4xf32, #tpu.memory_space<vmem>>, vector<1x2x4xf32>,
    %cst_123 = arith.constant dense<0.000000e+00> : vector<2x128xf32>
    %377 = tpu.matmul %372, %4, %cst_123 {dimension_numbers = #tpu.dot_dimension_numbers<[1], [0], [0], [1], [0, 0, 1, 1], [], []>} : vector<2x4xf32>, vector<4x128xf32>, vector<2x128xf32> -> vector<2x128xf32>
    %cst_124 = arith.constant dense<0.000000e+00> : vector<2x128xf32>
    %378 = tpu.matmul %336, %5, %cst_124 {dimension_numbers = #tpu.dot_dimension_numbers<[1], [0], [0], [1], [0, 0, 1, 1], [], []>} : vector<2x32xf32>, vector<32x128xf32>, vector<2x128xf32> -> vector<2x128xf32>
    %379 = arith.addf %377, %378 : vector<2x128xf32>
    %380 = arith.index_cast %c4_i32 : i32 to index
    %c0_125 = arith.constant 0 : index
    %c0_126 = arith.constant 0 : index
    %381 = vector.load %arg5[%380, %c0_125, %c0_126] : memref<8x2x128xf32, #tpu.memory_space<vmem>>, vector<1x2x128xf32>
    %382 = vector.shape_cast %381 : vector<1x2x128xf32> to vector<2x128xf32>
    %383 = arith.addf %379, %382 : vector<2x128xf32>
    %384 = arith.negf %383 : vector<2x128xf32>
    %385 = math.exp %384 : vector<2x128xf32>
    %cst_127 = arith.constant 1.000000e+00 : f32
    %386 = vector.broadcast %cst_127 : f32 to vector<2x128xf32>
    %387 = arith.addf %386, %385 : vector<2x128xf32>
    %388 = arith.divf %386, %387 : vector<2x128xf32>
    %389 = math.tanh %383 : vector<2x128xf32>
    %390 = vector.extract_strided_slice %388 {offsets = [0, 0], sizes = [2, 32], strides = [1, 1]} : vector<2x128xf32> to vector<2x32xf32>
    %391 = vector.extract_strided_slice %388 {offsets = [0, 32], sizes = [2, 32], strides = [1, 1]} : vector<2x128xf32> to vector<2x32xf32>
    %392 = vector.extract_strided_slice %389 {offsets = [0, 64], sizes = [2, 32], strides = [1, 1]} : vector<2x128xf32> to vector<2x32xf32>
    %393 = vector.extract_strided_slice %388 {offsets = [0, 96], sizes = [2, 32], strides = [1, 1]} : vector<2x128xf32> to vector<2x32xf32>
    %394 = arith.mulf %391, %318 : vector<2x32xf32>
    %395 = arith.mulf %390, %392 : vector<2x32xf32>
    %396 = arith.addf %394, %395 : vector<2x32xf32>
    %397 = math.tanh %396 : vector<2x32xf32>
    %398 = arith.mulf %393, %397 : vector<2x32xf32>
    %c5_i32 = arith.constant 5 : i32
    %399 = arith.index_cast %c5_i32 : i32 to index
    %c0_128 = arith.constant 0 : index
    %c0_129 = arith.constant 0 : index
    %400 = vector.load %arg0[%399, %c0_128, %c0_129] : memref<8x2x4xf32, #tpu.memory_space<vmem>>, vector<1x2x4xf32>
    %401 = vector.shape_cast %400 : vector<1x2x4xf32> to vector<2x4xf32>
    %402 = arith.index_cast %c5_i32 : i32 to index
    %c0_130 = arith.constant 0 : index
    %c0_131 = arith.constant 0 : index
    %403 = vector.load %arg1[%402, %c0_130, %c0_131] : memref<8x2x4xf32, #tpu.memory_space<vmem>>, vector<1x2x4xf32>
    %404 = vector.shape_cast %403 : vector<1x2x4xf32> to vector<2x4xf32>
    %405 = arith.index_cast %c5_i32 : i32 to index
    %c0_132 = arith.constant 0 : index
    %c0_133 = arith.constant 0 : index
    %406 = vector.load %arg2[%405, %c0_132, %c0_133] : memref<8x2x4xf32, #tpu.memory_space<vmem>>, vector<1x2x4xf32>
    %407 = vector.shape_cast %406 : vector<1x2x4xf32> to vector<2x4xf32>
    %408 = arith.index_cast %c5_i32 : i32 to index
    %c0_134 = arith.constant 0 : index
    %c0_135 = arith.constant 0 : index
    %409 = vector.load %arg4[%408, %c0_134, %c0_135] : memref<8x2x4xf32, #tpu.memory_space<vmem>>, vector<1x2x4xf32>
    %410 = vector.shape_cast %409 : vector<1x2x4xf32> to vector<2x4xf32>
    %411 = arith.index_cast %c5_i32 : i32 to index
    %c0_136 = arith.constant 0 : index
    %c0_137 = arith.constant 0 : index
    %412 = vector.load %arg3[%411, %c0_136, %c0_137] : memref<8x2x32xf32, #tpu.memory_space<vmem>>, vector<1x2x32xf32>
    %413 = vector.shape_cast %412 : vector<1x2x32xf32> to vector<2x32xf32>
    %414 = arith.mulf %398, %413 : vector<2x32xf32>
    %cst_138 = arith.constant dense<0.000000e+00> : vector<2x4xf32>
    %415 = tpu.matmul %414, %0, %cst_138 {dimension_numbers = #tpu.dot_dimension_numbers<[1], [0], [0], [1], [0, 0, 1, 1], [], []>} : vector<2x32xf32>, vector<32x4xf32>, vector<2x4xf32> -> vector<2x4xf32>
    %416 = vector.broadcast %1 : vector<1x4xf32> to vector<2x4xf32>
    %417 = arith.addf %415, %416 : vector<2x4xf32>
    %418 = arith.mulf %404, %401 : vector<2x4xf32>
    %cst_139 = arith.constant 1.000000e+00 : f32
    %419 = vector.broadcast %cst_139 : f32 to vector<2x4xf32>
    %420 = arith.subf %419, %404 : vector<2x4xf32>
    %421 = arith.mulf %420, %417 : vector<2x4xf32>
    %422 = arith.addf %418, %421 : vector<2x4xf32>
    %cst_140 = arith.constant dense<0.000000e+00> : vector<2x4xf32>
    %423 = tpu.matmul %422, %2, %cst_140 {dimension_numbers = #tpu.dot_dimension_numbers<[1], [0], [0], [1], [0, 0, 1, 1], [], []>} : vector<2x4xf32>, vector<4x4xf32>, vector<2x4xf32> -> vector<2x4xf32>
    %424 = vector.broadcast %3 : vector<1x4xf32> to vector<2x4xf32>
    %425 = arith.addf %423, %424 : vector<2x4xf32>
    %426 = arith.mulf %410, %425 : vector<2x4xf32>
    %cst_141 = arith.constant 1.000000e+00 : f32
    %427 = vector.broadcast %cst_141 : f32 to vector<2x4xf32>
    %428 = arith.subf %427, %410 : vector<2x4xf32>
    %429 = arith.mulf %428, %417 : vector<2x4xf32>
    %430 = arith.addf %426, %429 : vector<2x4xf32>
    %431 = arith.subf %401, %417 : vector<2x4xf32>
    %432 = math.absf %431 : vector<2x4xf32>
    %433 = arith.subf %401, %425 : vector<2x4xf32>
    %434 = math.absf %433 : vector<2x4xf32>
    %435 = arith.addf %432, %434 : vector<2x4xf32>
    %436 = arith.subf %401, %430 : vector<2x4xf32>
    %437 = math.absf %436 : vector<2x4xf32>
    %438 = arith.addf %435, %437 : vector<2x4xf32>
    %439 = arith.mulf %438, %407 : vector<2x4xf32>
    %440 = vector.shape_cast %439 : vector<2x4xf32> to vector<1x2x4xf32>
    %cst_142 = arith.constant dense<0.000000e+00> : vector<1xf32>
    %441 = vector.multi_reduction <add>, %440, %cst_142 [1, 2] : vector<1x2x4xf32> to vector<1xf32>
    %442 = vector.shape_cast %441 : vector<1xf32> to vector<1x1x1xf32>
    %443 = vector.extract %442[0, 0, 0] : f32 from vector<1x1x1xf32>
    %444 = vector.broadcast %443 : f32 to vector<1x1xf32>
    %445 = arith.addf %367, %444 : vector<1x1xf32>
    %446 = arith.mulf %404, %401 : vector<2x4xf32>
    %cst_143 = arith.constant 1.000000e+00 : f32
    %447 = vector.broadcast %cst_143 : f32 to vector<2x4xf32>
    %448 = arith.subf %447, %404 : vector<2x4xf32>
    %449 = arith.mulf %448, %430 : vector<2x4xf32>
    %450 = arith.addf %446, %449 : vector<2x4xf32>
    %451 = arith.index_cast %c5_i32 : i32 to index
    %c0_144 = arith.constant 0 : index
    %c0_145 = arith.constant 0 : index
    %452 = vector.load %arg13[%451, %c0_144, %c0_145] : memref<8x2x4xf32, #tpu.memory_space<vmem>>, vector<1x2x4xf32>
    %453 = vector.shape_cast %452 : vector<1x2x4xf32> to vector<2x4xf32>
    %454 = vector.shape_cast %450 : vector<2x4xf32> to vector<1x2x4xf32>
    tpu.vector_store %arg13[%451, %c0_144, %c0_145], %454 {strides = array<i32>} : memref<8x2x4xf32, #tpu.memory_space<vmem>>, vector<1x2x4xf32>,
    %cst_146 = arith.constant dense<0.000000e+00> : vector<2x128xf32>
    %455 = tpu.matmul %450, %4, %cst_146 {dimension_numbers = #tpu.dot_dimension_numbers<[1], [0], [0], [1], [0, 0, 1, 1], [], []>} : vector<2x4xf32>, vector<4x128xf32>, vector<2x128xf32> -> vector<2x128xf32>
    %cst_147 = arith.constant dense<0.000000e+00> : vector<2x128xf32>
    %456 = tpu.matmul %414, %5, %cst_147 {dimension_numbers = #tpu.dot_dimension_numbers<[1], [0], [0], [1], [0, 0, 1, 1], [], []>} : vector<2x32xf32>, vector<32x128xf32>, vector<2x128xf32> -> vector<2x128xf32>
    %457 = arith.addf %455, %456 : vector<2x128xf32>
    %458 = arith.index_cast %c5_i32 : i32 to index
    %c0_148 = arith.constant 0 : index
    %c0_149 = arith.constant 0 : index
    %459 = vector.load %arg5[%458, %c0_148, %c0_149] : memref<8x2x128xf32, #tpu.memory_space<vmem>>, vector<1x2x128xf32>
    %460 = vector.shape_cast %459 : vector<1x2x128xf32> to vector<2x128xf32>
    %461 = arith.addf %457, %460 : vector<2x128xf32>
    %462 = arith.negf %461 : vector<2x128xf32>
    %463 = math.exp %462 : vector<2x128xf32>
    %cst_150 = arith.constant 1.000000e+00 : f32
    %464 = vector.broadcast %cst_150 : f32 to vector<2x128xf32>
    %465 = arith.addf %464, %463 : vector<2x128xf32>
    %466 = arith.divf %464, %465 : vector<2x128xf32>
    %467 = math.tanh %461 : vector<2x128xf32>
    %468 = vector.extract_strided_slice %466 {offsets = [0, 0], sizes = [2, 32], strides = [1, 1]} : vector<2x128xf32> to vector<2x32xf32>
    %469 = vector.extract_strided_slice %466 {offsets = [0, 32], sizes = [2, 32], strides = [1, 1]} : vector<2x128xf32> to vector<2x32xf32>
    %470 = vector.extract_strided_slice %467 {offsets = [0, 64], sizes = [2, 32], strides = [1, 1]} : vector<2x128xf32> to vector<2x32xf32>
    %471 = vector.extract_strided_slice %466 {offsets = [0, 96], sizes = [2, 32], strides = [1, 1]} : vector<2x128xf32> to vector<2x32xf32>
    %472 = arith.mulf %469, %396 : vector<2x32xf32>
    %473 = arith.mulf %468, %470 : vector<2x32xf32>
    %474 = arith.addf %472, %473 : vector<2x32xf32>
    %475 = math.tanh %474 : vector<2x32xf32>
    %476 = arith.mulf %471, %475 : vector<2x32xf32>
    %c6_i32 = arith.constant 6 : i32
    %477 = arith.index_cast %c6_i32 : i32 to index
    %c0_151 = arith.constant 0 : index
    %c0_152 = arith.constant 0 : index
    %478 = vector.load %arg0[%477, %c0_151, %c0_152] : memref<8x2x4xf32, #tpu.memory_space<vmem>>, vector<1x2x4xf32>
    %479 = vector.shape_cast %478 : vector<1x2x4xf32> to vector<2x4xf32>
    %480 = arith.index_cast %c6_i32 : i32 to index
    %c0_153 = arith.constant 0 : index
    %c0_154 = arith.constant 0 : index
    %481 = vector.load %arg1[%480, %c0_153, %c0_154] : memref<8x2x4xf32, #tpu.memory_space<vmem>>, vector<1x2x4xf32>
    %482 = vector.shape_cast %481 : vector<1x2x4xf32> to vector<2x4xf32>
    %483 = arith.index_cast %c6_i32 : i32 to index
    %c0_155 = arith.constant 0 : index
    %c0_156 = arith.constant 0 : index
    %484 = vector.load %arg2[%483, %c0_155, %c0_156] : memref<8x2x4xf32, #tpu.memory_space<vmem>>, vector<1x2x4xf32>
    %485 = vector.shape_cast %484 : vector<1x2x4xf32> to vector<2x4xf32>
    %486 = arith.index_cast %c6_i32 : i32 to index
    %c0_157 = arith.constant 0 : index
    %c0_158 = arith.constant 0 : index
    %487 = vector.load %arg4[%486, %c0_157, %c0_158] : memref<8x2x4xf32, #tpu.memory_space<vmem>>, vector<1x2x4xf32>
    %488 = vector.shape_cast %487 : vector<1x2x4xf32> to vector<2x4xf32>
    %489 = arith.index_cast %c6_i32 : i32 to index
    %c0_159 = arith.constant 0 : index
    %c0_160 = arith.constant 0 : index
    %490 = vector.load %arg3[%489, %c0_159, %c0_160] : memref<8x2x32xf32, #tpu.memory_space<vmem>>, vector<1x2x32xf32>
    %491 = vector.shape_cast %490 : vector<1x2x32xf32> to vector<2x32xf32>
    %492 = arith.mulf %476, %491 : vector<2x32xf32>
    %cst_161 = arith.constant dense<0.000000e+00> : vector<2x4xf32>
    %493 = tpu.matmul %492, %0, %cst_161 {dimension_numbers = #tpu.dot_dimension_numbers<[1], [0], [0], [1], [0, 0, 1, 1], [], []>} : vector<2x32xf32>, vector<32x4xf32>, vector<2x4xf32> -> vector<2x4xf32>
    %494 = vector.broadcast %1 : vector<1x4xf32> to vector<2x4xf32>
    %495 = arith.addf %493, %494 : vector<2x4xf32>
    %496 = arith.mulf %482, %479 : vector<2x4xf32>
    %cst_162 = arith.constant 1.000000e+00 : f32
    %497 = vector.broadcast %cst_162 : f32 to vector<2x4xf32>
    %498 = arith.subf %497, %482 : vector<2x4xf32>
    %499 = arith.mulf %498, %495 : vector<2x4xf32>
    %500 = arith.addf %496, %499 : vector<2x4xf32>
    %cst_163 = arith.constant dense<0.000000e+00> : vector<2x4xf32>
    %501 = tpu.matmul %500, %2, %cst_163 {dimension_numbers = #tpu.dot_dimension_numbers<[1], [0], [0], [1], [0, 0, 1, 1], [], []>} : vector<2x4xf32>, vector<4x4xf32>, vector<2x4xf32> -> vector<2x4xf32>
    %502 = vector.broadcast %3 : vector<1x4xf32> to vector<2x4xf32>
    %503 = arith.addf %501, %502 : vector<2x4xf32>
    %504 = arith.mulf %488, %503 : vector<2x4xf32>
    %cst_164 = arith.constant 1.000000e+00 : f32
    %505 = vector.broadcast %cst_164 : f32 to vector<2x4xf32>
    %506 = arith.subf %505, %488 : vector<2x4xf32>
    %507 = arith.mulf %506, %495 : vector<2x4xf32>
    %508 = arith.addf %504, %507 : vector<2x4xf32>
    %509 = arith.subf %479, %495 : vector<2x4xf32>
    %510 = math.absf %509 : vector<2x4xf32>
    %511 = arith.subf %479, %503 : vector<2x4xf32>
    %512 = math.absf %511 : vector<2x4xf32>
    %513 = arith.addf %510, %512 : vector<2x4xf32>
    %514 = arith.subf %479, %508 : vector<2x4xf32>
    %515 = math.absf %514 : vector<2x4xf32>
    %516 = arith.addf %513, %515 : vector<2x4xf32>
    %517 = arith.mulf %516, %485 : vector<2x4xf32>
    %518 = vector.shape_cast %517 : vector<2x4xf32> to vector<1x2x4xf32>
    %cst_165 = arith.constant dense<0.000000e+00> : vector<1xf32>
    %519 = vector.multi_reduction <add>, %518, %cst_165 [1, 2] : vector<1x2x4xf32> to vector<1xf32>
    %520 = vector.shape_cast %519 : vector<1xf32> to vector<1x1x1xf32>
    %521 = vector.extract %520[0, 0, 0] : f32 from vector<1x1x1xf32>
    %522 = vector.broadcast %521 : f32 to vector<1x1xf32>
    %523 = arith.addf %445, %522 : vector<1x1xf32>
    %524 = arith.mulf %482, %479 : vector<2x4xf32>
    %cst_166 = arith.constant 1.000000e+00 : f32
    %525 = vector.broadcast %cst_166 : f32 to vector<2x4xf32>
    %526 = arith.subf %525, %482 : vector<2x4xf32>
    %527 = arith.mulf %526, %508 : vector<2x4xf32>
    %528 = arith.addf %524, %527 : vector<2x4xf32>
    %529 = arith.index_cast %c6_i32 : i32 to index
    %c0_167 = arith.constant 0 : index
    %c0_168 = arith.constant 0 : index
    %530 = vector.load %arg13[%529, %c0_167, %c0_168] : memref<8x2x4xf32, #tpu.memory_space<vmem>>, vector<1x2x4xf32>
    %531 = vector.shape_cast %530 : vector<1x2x4xf32> to vector<2x4xf32>
    %532 = vector.shape_cast %528 : vector<2x4xf32> to vector<1x2x4xf32>
    tpu.vector_store %arg13[%529, %c0_167, %c0_168], %532 {strides = array<i32>} : memref<8x2x4xf32, #tpu.memory_space<vmem>>, vector<1x2x4xf32>,
    %cst_169 = arith.constant dense<0.000000e+00> : vector<2x128xf32>
    %533 = tpu.matmul %528, %4, %cst_169 {dimension_numbers = #tpu.dot_dimension_numbers<[1], [0], [0], [1], [0, 0, 1, 1], [], []>} : vector<2x4xf32>, vector<4x128xf32>, vector<2x128xf32> -> vector<2x128xf32>
    %cst_170 = arith.constant dense<0.000000e+00> : vector<2x128xf32>
    %534 = tpu.matmul %492, %5, %cst_170 {dimension_numbers = #tpu.dot_dimension_numbers<[1], [0], [0], [1], [0, 0, 1, 1], [], []>} : vector<2x32xf32>, vector<32x128xf32>, vector<2x128xf32> -> vector<2x128xf32>
    %535 = arith.addf %533, %534 : vector<2x128xf32>
    %536 = arith.index_cast %c6_i32 : i32 to index
    %c0_171 = arith.constant 0 : index
    %c0_172 = arith.constant 0 : index
    %537 = vector.load %arg5[%536, %c0_171, %c0_172] : memref<8x2x128xf32, #tpu.memory_space<vmem>>, vector<1x2x128xf32>
    %538 = vector.shape_cast %537 : vector<1x2x128xf32> to vector<2x128xf32>
    %539 = arith.addf %535, %538 : vector<2x128xf32>
    %540 = arith.negf %539 : vector<2x128xf32>
    %541 = math.exp %540 : vector<2x128xf32>
    %cst_173 = arith.constant 1.000000e+00 : f32
    %542 = vector.broadcast %cst_173 : f32 to vector<2x128xf32>
    %543 = arith.addf %542, %541 : vector<2x128xf32>
    %544 = arith.divf %542, %543 : vector<2x128xf32>
    %545 = math.tanh %539 : vector<2x128xf32>
    %546 = vector.extract_strided_slice %544 {offsets = [0, 0], sizes = [2, 32], strides = [1, 1]} : vector<2x128xf32> to vector<2x32xf32>
    %547 = vector.extract_strided_slice %544 {offsets = [0, 32], sizes = [2, 32], strides = [1, 1]} : vector<2x128xf32> to vector<2x32xf32>
    %548 = vector.extract_strided_slice %545 {offsets = [0, 64], sizes = [2, 32], strides = [1, 1]} : vector<2x128xf32> to vector<2x32xf32>
    %549 = vector.extract_strided_slice %544 {offsets = [0, 96], sizes = [2, 32], strides = [1, 1]} : vector<2x128xf32> to vector<2x32xf32>
    %550 = arith.mulf %547, %474 : vector<2x32xf32>
    %551 = arith.mulf %546, %548 : vector<2x32xf32>
    %552 = arith.addf %550, %551 : vector<2x32xf32>
    %553 = math.tanh %552 : vector<2x32xf32>
    %554 = arith.mulf %549, %553 : vector<2x32xf32>
    %c7_i32 = arith.constant 7 : i32
    %555 = arith.index_cast %c7_i32 : i32 to index
    %c0_174 = arith.constant 0 : index
    %c0_175 = arith.constant 0 : index
    %556 = vector.load %arg0[%555, %c0_174, %c0_175] : memref<8x2x4xf32, #tpu.memory_space<vmem>>, vector<1x2x4xf32>
    %557 = vector.shape_cast %556 : vector<1x2x4xf32> to vector<2x4xf32>
    %558 = arith.index_cast %c7_i32 : i32 to index
    %c0_176 = arith.constant 0 : index
    %c0_177 = arith.constant 0 : index
    %559 = vector.load %arg1[%558, %c0_176, %c0_177] : memref<8x2x4xf32, #tpu.memory_space<vmem>>, vector<1x2x4xf32>
    %560 = vector.shape_cast %559 : vector<1x2x4xf32> to vector<2x4xf32>
    %561 = arith.index_cast %c7_i32 : i32 to index
    %c0_178 = arith.constant 0 : index
    %c0_179 = arith.constant 0 : index
    %562 = vector.load %arg2[%561, %c0_178, %c0_179] : memref<8x2x4xf32, #tpu.memory_space<vmem>>, vector<1x2x4xf32>
    %563 = vector.shape_cast %562 : vector<1x2x4xf32> to vector<2x4xf32>
    %564 = arith.index_cast %c7_i32 : i32 to index
    %c0_180 = arith.constant 0 : index
    %c0_181 = arith.constant 0 : index
    %565 = vector.load %arg4[%564, %c0_180, %c0_181] : memref<8x2x4xf32, #tpu.memory_space<vmem>>, vector<1x2x4xf32>
    %566 = vector.shape_cast %565 : vector<1x2x4xf32> to vector<2x4xf32>
    %567 = arith.index_cast %c7_i32 : i32 to index
    %c0_182 = arith.constant 0 : index
    %c0_183 = arith.constant 0 : index
    %568 = vector.load %arg3[%567, %c0_182, %c0_183] : memref<8x2x32xf32, #tpu.memory_space<vmem>>, vector<1x2x32xf32>
    %569 = vector.shape_cast %568 : vector<1x2x32xf32> to vector<2x32xf32>
    %570 = arith.mulf %554, %569 : vector<2x32xf32>
    %cst_184 = arith.constant dense<0.000000e+00> : vector<2x4xf32>
    %571 = tpu.matmul %570, %0, %cst_184 {dimension_numbers = #tpu.dot_dimension_numbers<[1], [0], [0], [1], [0, 0, 1, 1], [], []>} : vector<2x32xf32>, vector<32x4xf32>, vector<2x4xf32> -> vector<2x4xf32>
    %572 = vector.broadcast %1 : vector<1x4xf32> to vector<2x4xf32>
    %573 = arith.addf %571, %572 : vector<2x4xf32>
    %574 = arith.mulf %560, %557 : vector<2x4xf32>
    %cst_185 = arith.constant 1.000000e+00 : f32
    %575 = vector.broadcast %cst_185 : f32 to vector<2x4xf32>
    %576 = arith.subf %575, %560 : vector<2x4xf32>
    %577 = arith.mulf %576, %573 : vector<2x4xf32>
    %578 = arith.addf %574, %577 : vector<2x4xf32>
    %cst_186 = arith.constant dense<0.000000e+00> : vector<2x4xf32>
    %579 = tpu.matmul %578, %2, %cst_186 {dimension_numbers = #tpu.dot_dimension_numbers<[1], [0], [0], [1], [0, 0, 1, 1], [], []>} : vector<2x4xf32>, vector<4x4xf32>, vector<2x4xf32> -> vector<2x4xf32>
    %580 = vector.broadcast %3 : vector<1x4xf32> to vector<2x4xf32>
    %581 = arith.addf %579, %580 : vector<2x4xf32>
    %582 = arith.mulf %566, %581 : vector<2x4xf32>
    %cst_187 = arith.constant 1.000000e+00 : f32
    %583 = vector.broadcast %cst_187 : f32 to vector<2x4xf32>
    %584 = arith.subf %583, %566 : vector<2x4xf32>
    %585 = arith.mulf %584, %573 : vector<2x4xf32>
    %586 = arith.addf %582, %585 : vector<2x4xf32>
    %587 = arith.subf %557, %573 : vector<2x4xf32>
    %588 = math.absf %587 : vector<2x4xf32>
    %589 = arith.subf %557, %581 : vector<2x4xf32>
    %590 = math.absf %589 : vector<2x4xf32>
    %591 = arith.addf %588, %590 : vector<2x4xf32>
    %592 = arith.subf %557, %586 : vector<2x4xf32>
    %593 = math.absf %592 : vector<2x4xf32>
    %594 = arith.addf %591, %593 : vector<2x4xf32>
    %595 = arith.mulf %594, %563 : vector<2x4xf32>
    %596 = vector.shape_cast %595 : vector<2x4xf32> to vector<1x2x4xf32>
    %cst_188 = arith.constant dense<0.000000e+00> : vector<1xf32>
    %597 = vector.multi_reduction <add>, %596, %cst_188 [1, 2] : vector<1x2x4xf32> to vector<1xf32>
    %598 = vector.shape_cast %597 : vector<1xf32> to vector<1x1x1xf32>
    %599 = vector.extract %598[0, 0, 0] : f32 from vector<1x1x1xf32>
    %600 = vector.broadcast %599 : f32 to vector<1x1xf32>
    %601 = arith.addf %523, %600 : vector<1x1xf32>
    %602 = arith.mulf %560, %557 : vector<2x4xf32>
    %cst_189 = arith.constant 1.000000e+00 : f32
    %603 = vector.broadcast %cst_189 : f32 to vector<2x4xf32>
    %604 = arith.subf %603, %560 : vector<2x4xf32>
    %605 = arith.mulf %604, %586 : vector<2x4xf32>
    %606 = arith.addf %602, %605 : vector<2x4xf32>
    %607 = arith.index_cast %c7_i32 : i32 to index
    %c0_190 = arith.constant 0 : index
    %c0_191 = arith.constant 0 : index
    %608 = vector.load %arg13[%607, %c0_190, %c0_191] : memref<8x2x4xf32, #tpu.memory_space<vmem>>, vector<1x2x4xf32>
    %609 = vector.shape_cast %608 : vector<1x2x4xf32> to vector<2x4xf32>
    %610 = vector.shape_cast %606 : vector<2x4xf32> to vector<1x2x4xf32>
    tpu.vector_store %arg13[%607, %c0_190, %c0_191], %610 {strides = array<i32>} : memref<8x2x4xf32, #tpu.memory_space<vmem>>, vector<1x2x4xf32>,
    %cst_192 = arith.constant dense<0.000000e+00> : vector<2x128xf32>
    %611 = tpu.matmul %606, %4, %cst_192 {dimension_numbers = #tpu.dot_dimension_numbers<[1], [0], [0], [1], [0, 0, 1, 1], [], []>} : vector<2x4xf32>, vector<4x128xf32>, vector<2x128xf32> -> vector<2x128xf32>
    %cst_193 = arith.constant dense<0.000000e+00> : vector<2x128xf32>
    %612 = tpu.matmul %570, %5, %cst_193 {dimension_numbers = #tpu.dot_dimension_numbers<[1], [0], [0], [1], [0, 0, 1, 1], [], []>} : vector<2x32xf32>, vector<32x128xf32>, vector<2x128xf32> -> vector<2x128xf32>
    %613 = arith.addf %611, %612 : vector<2x128xf32>
    %614 = arith.index_cast %c7_i32 : i32 to index
    %c0_194 = arith.constant 0 : index
    %c0_195 = arith.constant 0 : index
    %615 = vector.load %arg5[%614, %c0_194, %c0_195] : memref<8x2x128xf32, #tpu.memory_space<vmem>>, vector<1x2x128xf32>
    %616 = vector.shape_cast %615 : vector<1x2x128xf32> to vector<2x128xf32>
    %617 = arith.addf %613, %616 : vector<2x128xf32>
    %618 = arith.negf %617 : vector<2x128xf32>
    %619 = math.exp %618 : vector<2x128xf32>
    %cst_196 = arith.constant 1.000000e+00 : f32
    %620 = vector.broadcast %cst_196 : f32 to vector<2x128xf32>
    %621 = arith.addf %620, %619 : vector<2x128xf32>
    %622 = arith.divf %620, %621 : vector<2x128xf32>
    %623 = math.tanh %617 : vector<2x128xf32>
    %624 = vector.extract_strided_slice %622 {offsets = [0, 0], sizes = [2, 32], strides = [1, 1]} : vector<2x128xf32> to vector<2x32xf32>
    %625 = vector.extract_strided_slice %622 {offsets = [0, 32], sizes = [2, 32], strides = [1, 1]} : vector<2x128xf32> to vector<2x32xf32>
    %626 = vector.extract_strided_slice %623 {offsets = [0, 64], sizes = [2, 32], strides = [1, 1]} : vector<2x128xf32> to vector<2x32xf32>
    %627 = vector.extract_strided_slice %622 {offsets = [0, 96], sizes = [2, 32], strides = [1, 1]} : vector<2x128xf32> to vector<2x32xf32>
    %628 = arith.mulf %625, %552 : vector<2x32xf32>
    %629 = arith.mulf %624, %626 : vector<2x32xf32>
    %630 = arith.addf %628, %629 : vector<2x32xf32>
    %631 = math.tanh %630 : vector<2x32xf32>
    %632 = arith.mulf %627, %631 : vector<2x32xf32>
    %c8_i32 = arith.constant 8 : i32
    %c0_197 = arith.constant 0 : index
    %c0_198 = arith.constant 0 : index
    %633 = vector.load %arg12[%c0_197, %c0_198] : memref<1x1xf32, #tpu.memory_space<vmem>>, vector<1x1xf32>
    tpu.vector_store %arg12[%c0_197, %c0_198], %601 {strides = array<i32>} : memref<1x1xf32, #tpu.memory_space<vmem>>, vector<1x1xf32>,
    return
  }
}

</mosaic_0001>

<bundles_post_ra>
// kernel: rits_forward.1
= control target key start
LH: loop header
LB: loop body
LE: loop exit
PB: predicated region body
PF: predicated region fallthrough
CT: control target
= control target key end

     0   :  { %v3402_v1 = vmov 0.0   ;;  %vm3403_vm0 = vmmov 0   ;;  %s4115_s0 = inlined_call_operand.vmem [shape: f32[8,2,4], index: 0, kind: input, shape index: {}]   ;;  %s4116_s1 = inlined_call_operand.vmem [shape: f32[8,2,4], index: 1, kind: input, shape index: {}]   ;;  %s4117_s2 = inlined_call_operand.vmem [shape: f32[8,2,4], index: 2, kind: input, shape index: {}]   ;;  %s4118_s3 = inlined_call_operand.vmem [shape: f32[8,2,32], index: 3, kind: input, shape index: {}]   ;;  %s4119_s4 = inlined_call_operand.vmem [shape: f32[8,2,4], index: 4, kind: input, shape index: {}]   ;;  %s4120_s5 = inlined_call_operand.vmem [shape: f32[8,2,128], index: 5, kind: input, shape index: {}]   ;;  %s4121_s6 = inlined_call_operand.vmem [shape: f32[32,4], index: 6, kind: input, shape index: {}]   ;;  %s4122_s7 = inlined_call_operand.vmem [shape: f32[1,4], index: 7, kind: input, shape index: {}]   ;;  %s4123_s8 = inlined_call_operand.vmem [shape: f32[4,4], index: 8, kind: input, shape index: {}]   ;;  %s4124_s9 = inlined_call_operand.vmem [shape: f32[1,4], index: 9, kind: input, shape index: {}]   ;;  %s4125_s10 = inlined_call_operand.vmem [shape: f32[4,128], index: 10, kind: input, shape index: {}]   ;;  %s4126_s11 = inlined_call_operand.vmem [shape: f32[32,128], index: 11, kind: input, shape index: {}]   ;;  %s4127_s12 = inlined_call_operand.hbm [shape: f32[1,1], index: 12, kind: output, shape index: {0}]   ;;  %s4128_s13 = inlined_call_operand.vmem [shape: f32[8,2,4], index: 13, kind: output, shape index: {1}]  }
   0x1   :  { %v3481_v0 = vld [vmem:[%s4121_s6 + $0x18] sm:$0xff]  ;;  %3050 = vmatprep.subr.mxu0 %v3402_v1  ;;  %v3487_v2 = vld [vmem:[%s4121_s6 + $0x10] sm:$0xff]  ;;  %3058 = vmatprep.mubr.msk.f32.mxu0 %vm3403_vm0, %v3402_v1  ;;  %v60_v3 = vld [vmem:[%s4118_s3] sm:$0x3] }
   0x2   :  { %3051 = vmatpush3.msra.mxu0 %v3481_v0  ;;  %3061 = vmatprep.subr.mxu1 %v3402_v1  ;;  %v3500_v4 = vld [vmem:[%s4121_s6 + $0x8] sm:$0xff] }
   0x3   :  { %3052 = vmatprep.subr.mxu0 %v3402_v1  ;;  %3063 = vmatprep.mubr.msk.f32.mxu1 %vm3403_vm0, %v3402_v1 }
   0x4   :  { %19 = vsyncpa [#allocation3], 0  ;;  %3053 = vmatpush3.msra.mxu0 %v3487_v2  ;;  %v3509_v5 = vld [vmem:[%s4121_s6] sm:$0xff]  ;;  %v61_v6 = vmul.f32 0.0, %v60_v3  ;;  %vm68_vm1 = vcmask 261120   ;;  %vm156_vm2 = vcmask 1043456  }
   0x5   :  { %3054 = vmatprep.subr.mxu0 %v3402_v1  ;;  %v3521_v7 = vld [vmem:[%s4123_s8] sm:$0xf]  ;;  %vm152_vm3 = vcmask 31744   ;;  %v3544_v18 = vld [vmem:[%s4126_s11 + $0x18] sm:$0xff]  ;;  %v3551_v19 = vld [vmem:[%s4126_s11 + $0x10] sm:$0xff]  ;;  %vm243_vm4 = vcmask 25600  }
   0x6   :  { %3055 = vmatpush3.msra.mxu0 %v3500_v4  ;;  %3062 = vmatpush3.msk.msra.mxu1 %vm156_vm2, %v3521_v7  ;;  %v57_v8 = vld [vmem:[%s4116_s1] sm:$0x3]  ;;  %v3558_v20 = vld [vmem:[%s4126_s11 + $0x8] sm:$0xff]  ;;  %s3404_s27 = smov 64   ;;  %s3405_s28 = smov 32   ;;  %vm2823_vm5 = vcmask 0  }
   0x7   :  { %3056 = vmatprep.subr.mxu0 %v3402_v1  ;;  %3066 = vmatprep.subr.mxu1 %v3402_v1  ;;  %v3532_v9 = vld [vmem:[%s4122_s7] ss:$0 sm:$0xff]  ;;  %v143_v11 = vsub.f32 1.0, %v57_v8  ;;  %v2856_v60 = vld [vmem:[%s4118_s3 + $0x2] sm:$0x3]  ;;  %s3406_s14 = smov 96  }
   0x8   :  { %3057 = vmatpush3.msra.mxu0 %v3509_v5  ;;  %v56_v10 = vld [vmem:[%s4115_s0] sm:$0x3] }
   0x9   :  { %3059 = vmatmul.mubr.msk.f32.vlgmr.msra.gmra.mxu0 %vm68_vm1, %v61_v6  ;;  %3077 = vmatprep.subr.mxu0 %v3402_v1  ;;  %v142_v14 = vmul.f32 %v57_v8, %v56_v10  ;;  %v3565_v21 = vld [vmem:[%s4126_s11] sm:$0xff] }
   0xa   :  { %3079 = vmatprep.mubr.msk.f32.mxu0 %vm3403_vm0, %v3402_v1  ;;  %v3571_v22 = vld [vmem:[%s4125_s10] sm:$0xf] }
   0xb   :  { %3078 = vmatpush3.msk.msra.mxu0 %vm156_vm2, %v3571_v22  ;;  %v59_v23 = vld [vmem:[%s4119_s4] sm:$0x3]  ;;  %v2853_v8 = vld [vmem:[%s4116_s1 + $0x2] sm:$0x3] }
   0xc   :  { %3093 = vmatprep.subr.mxu0 %v3402_v1  ;;  %v3594_v24 = vld [vmem:[%s4124_s9] ss:$0 sm:$0xff]  ;;  %v231_v25 = vsub.f32 1.0, %v59_v23 }
   0xd   :  { %v405_v45 = vld [vmem:[%s4120_s5] sm:$0x3] }
  0xc9   :  { %v138_v12 = vpop.f32.mrf.mxu0 }
  0xca   :  { %v139_v13 = vadd.f32 %v3532_v9, %v138_v12 }
  0xcb   :  { %v3060_v15 = vpop.f32.mrf.mxu0 }
  0xcc   :  { %v144_v16 = vmul.f32 %v143_v11, %v139_v13  ;;  %v234_v27 = vsub.f32 %v56_v10, %v139_v13  ;;  %v232_v31 = vmul.f32 %v231_v25, %v139_v13 }
  0xce   :  { %v145_v17 = vadd.f32 %v144_v16, %v142_v14  ;;  %v235_v33 = vand.u32 2147483647, %v234_v27 }
  0xd0   :  { %3064 = vmatmul.mubr.msk.f32.vlgmr.msra.gmra.mxu1 %vm152_vm3, %v145_v17 }
  0xd1   :  { %3074 = vmatprep.mubr.msk.f32.mxu1 %vm3403_vm0, %v3402_v1  ;;  %3067 = vmatpush3.msra.mxu1 %v3544_v18 }
  0xd2   :  { %3068 = vmatprep.subr.mxu1 %v3402_v1 }
  0xd3   :  { %3069 = vmatpush3.msra.mxu1 %v3551_v19 }
  0xd4   :  { %3070 = vmatprep.subr.mxu1 %v3402_v1 }
  0xd5   :  { %3071 = vmatpush3.msra.mxu1 %v3558_v20 }
  0xd6   :  { %3072 = vmatprep.subr.mxu1 %v3402_v1 }
  0xd7   :  { %3073 = vmatpush3.msra.mxu1 %v3565_v21 }
  0xd8   :  { %3075 = vmatmul.mubr.msk.f32.vlgmr.msra.gmra.mxu1 %vm68_vm1, %v61_v6  ;;  %3082 = vmatprep.subr.mxu1 %v3402_v1 }
  0xd9   :  { %3083 = vmatpush3.msra.mxu1 %v3481_v0  ;;  %3090 = vmatprep.mubr.msk.f32.mxu1 %vm3403_vm0, %v3402_v1 }
  0xda   :  { %3084 = vmatprep.subr.mxu1 %v3402_v1 }
  0xdb   :  { %3085 = vmatpush3.msra.mxu1 %v3487_v2 }
  0xdc   :  { %3086 = vmatprep.subr.mxu1 %v3402_v1 }
  0xdd   :  { %3087 = vmatpush3.msra.mxu1 %v3500_v4 }
  0xde   :  { %3088 = vmatprep.subr.mxu1 %v3402_v1 }
  0xdf   :  { %3089 = vmatpush3.msra.mxu1 %v3509_v5 }
  0xe0   :  { %3109 = vmatprep.subr.mxu1 %v3402_v1 }
 0x190   :  { %v226_v26 = vpop.f32.mrf.mxu1 }
 0x191   :  { %v227_v28 = vadd.f32 %v3594_v24, %v226_v26 }
 0x192   :  { %v3065_v29 = vpop.f32.mrf.mxu1 }
 0x193   :  { %v230_v30 = vmul.f32 %v227_v28, %v59_v23  ;;  %v236_v32 = vsub.f32 %v56_v10, %v227_v28  ;;  %v2855_v23 = vld [vmem:[%s4119_s4 + $0x2] sm:$0x3] }
 0x194   :  { %v599_v25 = vsub.f32 1.0, %v2855_v23 }
 0x195   :  { %v233_v34 = vadd.f32 %v232_v31, %v230_v30  ;;  %v237_v35 = vand.u32 2147483647, %v236_v32 }
 0x197   :  { %v238_v36 = vadd.f32 %v237_v35, %v235_v33  ;;  %v239_v37 = vsub.f32 %v56_v10, %v233_v34  ;;  %v256_v38 = vmul.f32 %v233_v34, %v143_v11  ;;  %v2852_v10 = vld [vmem:[%s4115_s0 + $0x2] sm:$0x3]  ;;  %v522_v11 = vsub.f32 1.0, %v2853_v8 }
 0x198   :  { %v325_v42 = vpop.f32.mrf.mxu1 }
 0x199   :  { %v257_v39 = vadd.f32 %v256_v38, %v142_v14  ;;  %v240_v40 = vand.u32 2147483647, %v239_v37  ;;  %v521_v14 = vmul.f32 %v2853_v8, %v2852_v10 }
 0x19a   :  { %v3076_v43 = vpop.f32.mrf.mxu1 }
 0x19b   :  { %258 = vst.msk [vmem:[%s4128_s13] sm:$0x3] %vm243_vm4, %v257_v39  ;;  %3080 = vmatmul.mubr.msk.f32.vlgmr.msra.gmra.mxu0 %vm152_vm3, %v257_v39  ;;  %v3602_v41 = vadd.f32 %v240_v40, %v238_v36 }
 0x19c   :  { %3094 = vmatpush3.msk.msra.mxu0 %vm156_vm2, %v3521_v7  ;;  %3095 = vmatprep.mubr.msk.f32.mxu0 %vm3403_vm0, %v3402_v1 }
 0x19d   :  { %3098 = vmatprep.subr.mxu0 %v3402_v1 }
 0x25b   :  { %v401_v44 = vpop.f32.mrf.mxu0 }
 0x25c   :  { %v402_v46 = vadd.f32 %v401_v44, %v325_v42 }
 0x25d   :  { %v3081_v47 = vpop.f32.mrf.mxu0 }
 0x25e   :  { %v406_v48 = vadd.f32 %v405_v45, %v402_v46  ;;  %v2864_v46 = vld [vmem:[%s4120_s5 + $0x2] sm:$0x3] }
 0x260   :  { %3312 = vtanh.f32 %v406_v48  ;;  %v2851_v50 = vmul.f32 -1.442695, %v406_v48 }
 0x262   :  { %3314 = vpow2.f32 %v2851_v50 }
 0x26d   :  { %v3313_v49 = vpop.eup %3312 }
 0x26e   :  { %416 = vrot.lane.b32.xlu0 %v3313_v49, %s3404_s27 }
 0x26f   :  { %v3315_v51 = vpop.eup %3314 }
 0x270   :  { %v410_v52 = vadd.f32 1.0, %v3315_v51 }
 0x272   :  { %3316 = vrcp.f32 %v410_v52 }
 0x27f   :  { %v3317_v53 = vpop.eup %3316 }
 0x280   :  { %v414_v56 = vmul.f32 0.0, %v3317_v53 }
 0x2e0   :  { %v417_v54 = vpop.permute.xlu0 %416 }
 0x2e1   :  { %v419_v55 = vmul.f32 %v3317_v53, %v417_v54 }
 0x2e3   :  { %421 = vrot.lane.b32.xlu0 %v419_v55, %s3405_s28 }
 0x355   :  { %v422_v57 = vpop.permute.xlu0 %421 }
 0x356   :  { %v3614_v58 = vadd.f32 %v422_v57, %v414_v56  ;;  %v2870_v57 = vld [vmem:[%s4118_s3 + $0x4] sm:$0x3] }
 0x358   :  { %3318 = vtanh.f32 %v3614_v58 }
 0x365   :  { %v3319_v59 = vpop.eup %3318 }
 0x366   :  { %427 = vrot.lane.b32.xlu1 %v3319_v59, %s3404_s27 }
 0x36a   :  { %442 = vrot.lane.b32.xlu1 %v2856_v60, %s3406_s14 }
 0x3d8   :  { %v428_v61 = vpop.permute.xlu1 %427 }
 0x3d9   :  { %v430_v62 = vmul.f32 %v3317_v53, %v428_v61 }
 0x3dc   :  { %v443_v63 = vpop.permute.xlu1 %442 }
 0x3dd   :  { %v445_v3 = vmul.f32 %v443_v63, %v430_v62 }
 0x3df   :  { %447 = vrot.lane.b32.xlu0 %v445_v3, %s3405_s28 }
 0x451   :  { %v448_v6 = vpop.permute.xlu0 %447 }
 0x452   :  { %3091 = vmatmul.mubr.msk.f32.vlgmr.msra.gmra.mxu1 %vm68_vm1, %v448_v6 }
 0x453   :  { %3110 = vmatpush3.msk.msra.mxu1 %vm156_vm2, %v3571_v22  ;;  %3111 = vmatprep.mubr.msk.f32.mxu1 %vm3403_vm0, %v3402_v1 }
 0x454   :  { %3114 = vmatprep.subr.mxu1 %v3402_v1 }
 0x512   :  { %v517_v12 = vpop.f32.mrf.mxu1 }
 0x513   :  { %v518_v13 = vadd.f32 %v3532_v9, %v517_v12 }
 0x514   :  { %v3092_v15 = vpop.f32.mrf.mxu1 }
 0x515   :  { %v523_v16 = vmul.f32 %v522_v11, %v518_v13  ;;  %v602_v27 = vsub.f32 %v2852_v10, %v518_v13  ;;  %v600_v31 = vmul.f32 %v599_v25, %v518_v13  ;;  %v2869_v25 = vld [vmem:[%s4119_s4 + $0x4] sm:$0x3] }
 0x517   :  { %v524_v17 = vadd.f32 %v523_v16, %v521_v14  ;;  %v603_v33 = vand.u32 2147483647, %v602_v27 }
 0x519   :  { %3096 = vmatmul.mubr.msk.f32.vlgmr.msra.gmra.mxu0 %vm152_vm3, %v524_v17 }
 0x51a   :  { %3099 = vmatpush3.msra.mxu0 %v3544_v18  ;;  %3106 = vmatprep.mubr.msk.f32.mxu0 %vm3403_vm0, %v3402_v1 }
 0x51b   :  { %3100 = vmatprep.subr.mxu0 %v3402_v1 }
 0x51c   :  { %3101 = vmatpush3.msra.mxu0 %v3551_v19 }
 0x51d   :  { %3102 = vmatprep.subr.mxu0 %v3402_v1 }
 0x51e   :  { %3103 = vmatpush3.msra.mxu0 %v3558_v20 }
 0x51f   :  { %3104 = vmatprep.subr.mxu0 %v3402_v1 }
 0x520   :  { %3105 = vmatpush3.msra.mxu0 %v3565_v21 }
 0x521   :  { %3107 = vmatmul.mubr.msk.f32.vlgmr.msra.gmra.mxu0 %vm68_vm1, %v448_v6  ;;  %3125 = vmatprep.subr.mxu0 %v3402_v1 }
 0x522   :  { %3126 = vmatpush3.msk.msra.mxu0 %vm156_vm2, %v3521_v7  ;;  %3127 = vmatprep.mubr.msk.f32.mxu0 %vm3403_vm0, %v3402_v1 }
 0x523   :  { %3130 = vmatprep.subr.mxu0 %v3402_v1 }
 0x5d9   :  { %v594_v26 = vpop.f32.mrf.mxu0 }
 0x5da   :  { %v595_v28 = vadd.f32 %v3594_v24, %v594_v26  ;;  %v965_v26 = vsub.f32 1.0, %v2869_v25 }
 0x5db   :  { %v3097_v29 = vpop.f32.mrf.mxu0 }
 0x5dc   :  { %v598_v30 = vmul.f32 %v2855_v23, %v595_v28  ;;  %v604_v32 = vsub.f32 %v2852_v10, %v595_v28 }
 0x5de   :  { %v601_v34 = vadd.f32 %v600_v31, %v598_v30  ;;  %v605_v35 = vand.u32 2147483647, %v604_v32 }
 0x5e0   :  { %v606_v36 = vadd.f32 %v605_v35, %v603_v33  ;;  %v607_v37 = vsub.f32 %v2852_v10, %v601_v34  ;;  %v623_v38 = vmul.f32 %v601_v34, %v522_v11  ;;  %v2866_v11 = vld [vmem:[%s4115_s0 + $0x4] sm:$0x3] }
 0x5e1   :  { %v693_v39 = vpop.f32.mrf.mxu0 }
 0x5e2   :  { %v624_v40 = vadd.f32 %v623_v38, %v521_v14  ;;  %v608_v42 = vand.u32 2147483647, %v607_v37 }
 0x5e3   :  { %v3108_v43 = vpop.f32.mrf.mxu0 }
 0x5e4   :  { %2860 = vst.msk [vmem:[%s4128_s13 + $0x2] sm:$0x3] %vm243_vm4, %v624_v40  ;;  %3112 = vmatmul.mubr.msk.f32.vlgmr.msra.gmra.mxu1 %vm152_vm3, %v624_v40  ;;  %v3662_v44 = vadd.f32 %v608_v42, %v606_v36 }
 0x5e5   :  { %3115 = vmatpush3.msra.mxu1 %v3481_v0  ;;  %3122 = vmatprep.mubr.msk.f32.mxu1 %vm3403_vm0, %v3402_v1 }
 0x5e6   :  { %3116 = vmatprep.subr.mxu1 %v3402_v1 }
 0x5e7   :  { %3117 = vmatpush3.msra.mxu1 %v3487_v2 }
 0x5e8   :  { %3118 = vmatprep.subr.mxu1 %v3402_v1 }
 0x5e9   :  { %3119 = vmatpush3.msra.mxu1 %v3500_v4 }
 0x5ea   :  { %3120 = vmatprep.subr.mxu1 %v3402_v1 }
 0x5eb   :  { %3121 = vmatpush3.msra.mxu1 %v3509_v5 }
 0x5ec   :  { %3141 = vmatprep.subr.mxu1 %v3402_v1 }
 0x6a4   :  { %v766_v45 = vpop.f32.mrf.mxu1 }
 0x6a5   :  { %v767_v47 = vadd.f32 %v766_v45, %v693_v39 }
 0x6a6   :  { %v3113_v48 = vpop.f32.mrf.mxu1 }
 0x6a7   :  { %v772_v49 = vadd.f32 %v2864_v46, %v767_v47  ;;  %v2878_v48 = vld [vmem:[%s4120_s5 + $0x4] sm:$0x3] }
 0x6a9   :  { %3320 = vtanh.f32 %v772_v49  ;;  %v2865_v51 = vmul.f32 -1.442695, %v772_v49 }
 0x6ab   :  { %3322 = vpow2.f32 %v2865_v51 }
 0x6b6   :  { %v3321_v50 = vpop.eup %3320 }
 0x6b7   :  { %782 = vrot.lane.b32.xlu1 %v3321_v50, %s3404_s27 }
 0x6b8   :  { %v3323_v52 = vpop.eup %3322 }
 0x6b9   :  { %v776_v53 = vadd.f32 1.0, %v3323_v52 }
 0x6bb   :  { %3324 = vrcp.f32 %v776_v53 }
 0x6c8   :  { %v3325_v54 = vpop.eup %3324 }
 0x6c9   :  { %v780_v59 = vmul.f32 %v3325_v54, %v3614_v58  ;;  %v2867_v58 = vld [vmem:[%s4116_s1 + $0x4] sm:$0x3] }
 0x6ca   :  { %v888_v12 = vsub.f32 1.0, %v2867_v58  ;;  %v887_v15 = vmul.f32 %v2867_v58, %v2866_v11 }
 0x729   :  { %v783_v55 = vpop.permute.xlu1 %782 }
 0x72a   :  { %v785_v56 = vmul.f32 %v3325_v54, %v783_v55 }
 0x72c   :  { %787 = vrot.lane.b32.xlu0 %v785_v56, %s3405_s28 }
 0x730   :  { %808 = vrot.lane.b32.xlu0 %v2870_v57, %s3406_s14 }
 0x79e   :  { %v788_v60 = vpop.permute.xlu0 %787 }
 0x79f   :  { %v3684_v61 = vadd.f32 %v788_v60, %v780_v59  ;;  %v2884_v60 = vld [vmem:[%s4118_s3 + $0x6] sm:$0x3] }
 0x7a1   :  { %3326 = vtanh.f32 %v3684_v61 }
 0x7a2   :  { %v809_v3 = vpop.permute.xlu0 %808 }
 0x7ae   :  { %v3327_v62 = vpop.eup %3326 }
 0x7af   :  { %793 = vrot.lane.b32.xlu1 %v3327_v62, %s3404_s27 }
 0x821   :  { %v794_v63 = vpop.permute.xlu1 %793 }
 0x822   :  { %v796_v6 = vmul.f32 %v3325_v54, %v794_v63 }
 0x824   :  { %v811_v8 = vmul.f32 %v809_v3, %v796_v6 }
 0x826   :  { %813 = vrot.lane.b32.xlu1 %v811_v8, %s3405_s28 }
 0x898   :  { %v814_v10 = vpop.permute.xlu1 %813 }
 0x899   :  { %3123 = vmatmul.mubr.msk.f32.vlgmr.msra.gmra.mxu1 %vm68_vm1, %v814_v10 }
 0x89a   :  { %3142 = vmatpush3.msk.msra.mxu1 %vm156_vm2, %v3571_v22  ;;  %3143 = vmatprep.mubr.msk.f32.mxu1 %vm3403_vm0, %v3402_v1 }
 0x89b   :  { %3146 = vmatprep.subr.mxu1 %v3402_v1 }
 0x959   :  { %v883_v13 = vpop.f32.mrf.mxu1 }
 0x95a   :  { %v884_v14 = vadd.f32 %v3532_v9, %v883_v13  ;;  %v2880_v13 = vld [vmem:[%s4115_s0 + $0x6] sm:$0x3] }
 0x95b   :  { %v3124_v16 = vpop.f32.mrf.mxu1 }
 0x95c   :  { %v889_v17 = vmul.f32 %v888_v12, %v884_v14  ;;  %v968_v28 = vsub.f32 %v2866_v11, %v884_v14  ;;  %v966_v32 = vmul.f32 %v965_v26, %v884_v14 }
 0x95e   :  { %v890_v23 = vadd.f32 %v889_v17, %v887_v15  ;;  %v969_v34 = vand.u32 2147483647, %v968_v28 }
 0x960   :  { %3128 = vmatmul.mubr.msk.f32.vlgmr.msra.gmra.mxu0 %vm152_vm3, %v890_v23 }
 0x961   :  { %3131 = vmatpush3.msra.mxu0 %v3544_v18  ;;  %3138 = vmatprep.mubr.msk.f32.mxu0 %vm3403_vm0, %v3402_v1 }
 0x962   :  { %3132 = vmatprep.subr.mxu0 %v3402_v1 }
 0x963   :  { %3133 = vmatpush3.msra.mxu0 %v3551_v19 }
 0x964   :  { %3134 = vmatprep.subr.mxu0 %v3402_v1 }
 0x965   :  { %3135 = vmatpush3.msra.mxu0 %v3558_v20 }
 0x966   :  { %3136 = vmatprep.subr.mxu0 %v3402_v1 }
 0x967   :  { %3137 = vmatpush3.msra.mxu0 %v3565_v21 }
 0x968   :  { %3139 = vmatmul.mubr.msk.f32.vlgmr.msra.gmra.mxu0 %vm68_vm1, %v814_v10  ;;  %3157 = vmatprep.subr.mxu0 %v3402_v1 }
 0x969   :  { %3158 = vmatpush3.msk.msra.mxu0 %vm156_vm2, %v3521_v7  ;;  %3159 = vmatprep.mubr.msk.f32.mxu0 %vm3403_vm0, %v3402_v1 }
 0x96a   :  { %3162 = vmatprep.subr.mxu0 %v3402_v1 }
 0xa20   :  { %v960_v27 = vpop.f32.mrf.mxu0 }
 0xa21   :  { %v961_v29 = vadd.f32 %v3594_v24, %v960_v27  ;;  %v2883_v27 = vld [vmem:[%s4119_s4 + $0x6] sm:$0x3] }
 0xa22   :  { %v3129_v30 = vpop.f32.mrf.mxu0  ;;  %v1331_v28 = vsub.f32 1.0, %v2883_v27 }
 0xa23   :  { %v964_v31 = vmul.f32 %v2869_v25, %v961_v29  ;;  %v970_v33 = vsub.f32 %v2866_v11, %v961_v29 }
 0xa25   :  { %v967_v35 = vadd.f32 %v966_v32, %v964_v31  ;;  %v971_v36 = vand.u32 2147483647, %v970_v33 }
 0xa27   :  { %v972_v37 = vadd.f32 %v971_v36, %v969_v34  ;;  %v973_v38 = vsub.f32 %v2866_v11, %v967_v35  ;;  %v989_v39 = vmul.f32 %v967_v35, %v888_v12 }
 0xa28   :  { %v1059_v40 = vpop.f32.mrf.mxu0 }
 0xa29   :  { %v990_v42 = vadd.f32 %v989_v39, %v887_v15  ;;  %v974_v43 = vand.u32 2147483647, %v973_v38 }
 0xa2a   :  { %v3140_v45 = vpop.f32.mrf.mxu0 }
 0xa2b   :  { %2874 = vst.msk [vmem:[%s4128_s13 + $0x4] sm:$0x3] %vm243_vm4, %v990_v42  ;;  %3144 = vmatmul.mubr.msk.f32.vlgmr.msra.gmra.mxu1 %vm152_vm3, %v990_v42  ;;  %v3728_v46 = vadd.f32 %v974_v43, %v972_v37 }
 0xa2c   :  { %3147 = vmatpush3.msra.mxu1 %v3481_v0  ;;  %3154 = vmatprep.mubr.msk.f32.mxu1 %vm3403_vm0, %v3402_v1 }
 0xa2d   :  { %3148 = vmatprep.subr.mxu1 %v3402_v1 }
 0xa2e   :  { %3149 = vmatpush3.msra.mxu1 %v3487_v2 }
 0xa2f   :  { %3150 = vmatprep.subr.mxu1 %v3402_v1 }
 0xa30   :  { %3151 = vmatpush3.msra.mxu1 %v3500_v4 }
 0xa31   :  { %3152 = vmatprep.subr.mxu1 %v3402_v1 }
 0xa32   :  { %3153 = vmatpush3.msra.mxu1 %v3509_v5 }
 0xa33   :  { %3173 = vmatprep.subr.mxu1 %v3402_v1 }
 0xaeb   :  { %v1132_v47 = vpop.f32.mrf.mxu1 }
 0xaec   :  { %v1133_v49 = vadd.f32 %v1132_v47, %v1059_v40 }
 0xaed   :  { %v3145_v50 = vpop.f32.mrf.mxu1 }
 0xaee   :  { %v1138_v51 = vadd.f32 %v2878_v48, %v1133_v49 }
 0xaf0   :  { %3328 = vtanh.f32 %v1138_v51  ;;  %v2879_v53 = vmul.f32 -1.442695, %v1138_v51  ;;  %v2892_v51 = vld [vmem:[%s4120_s5 + $0x6] sm:$0x3] }
 0xaf2   :  { %3330 = vpow2.f32 %v2879_v53 }
 0xafd   :  { %v3329_v52 = vpop.eup %3328 }
 0xafe   :  { %1148 = vrot.lane.b32.xlu0 %v3329_v52, %s3404_s27 }
 0xaff   :  { %v3331_v54 = vpop.eup %3330 }
 0xb00   :  { %v1142_v55 = vadd.f32 1.0, %v3331_v54 }
 0xb02   :  { %3332 = vrcp.f32 %v1142_v55 }
 0xb0f   :  { %v3333_v56 = vpop.eup %3332 }
 0xb10   :  { %v1146_v62 = vmul.f32 %v3333_v56, %v3684_v61  ;;  %v2881_v61 = vld [vmem:[%s4116_s1 + $0x6] sm:$0x3] }
 0xb11   :  { %v1254_v14 = vsub.f32 1.0, %v2881_v61  ;;  %v1253_v17 = vmul.f32 %v2881_v61, %v2880_v13 }
 0xb70   :  { %v1149_v57 = vpop.permute.xlu0 %1148 }
 0xb71   :  { %v1151_v59 = vmul.f32 %v3333_v56, %v1149_v57 }
 0xb73   :  { %1153 = vrot.lane.b32.xlu1 %v1151_v59, %s3405_s28 }
 0xb77   :  { %1174 = vrot.lane.b32.xlu1 %v2884_v60, %s3406_s14 }
 0xbe5   :  { %v1154_v63 = vpop.permute.xlu1 %1153 }
 0xbe6   :  { %v3750_v3 = vadd.f32 %v1154_v63, %v1146_v62 }
 0xbe8   :  { %3334 = vtanh.f32 %v3750_v3 }
 0xbe9   :  { %v1175_v10 = vpop.permute.xlu1 %1174 }
 0xbf5   :  { %v3335_v6 = vpop.eup %3334 }
 0xbf6   :  { %1159 = vrot.lane.b32.xlu0 %v3335_v6, %s3404_s27  ;;  %v2898_v6 = vld [vmem:[%s4118_s3 + $0x8] sm:$0x3] }
 0xc68   :  { %v1160_v8 = vpop.permute.xlu0 %1159 }
 0xc69   :  { %v1162_v58 = vmul.f32 %v3333_v56, %v1160_v8 }
 0xc6b   :  { %v1177_v11 = vmul.f32 %v1175_v10, %v1162_v58 }
 0xc6d   :  { %1179 = vrot.lane.b32.xlu0 %v1177_v11, %s3405_s28 }
 0xcdf   :  { %v1180_v12 = vpop.permute.xlu0 %1179 }
 0xce0   :  { %3155 = vmatmul.mubr.msk.f32.vlgmr.msra.gmra.mxu1 %vm68_vm1, %v1180_v12 }
 0xce1   :  { %3174 = vmatpush3.msk.msra.mxu1 %vm156_vm2, %v3571_v22  ;;  %3175 = vmatprep.mubr.msk.f32.mxu1 %vm3403_vm0, %v3402_v1 }
 0xce2   :  { %3178 = vmatprep.subr.mxu1 %v3402_v1 }
 0xda0   :  { %v1249_v15 = vpop.f32.mrf.mxu1 }
 0xda1   :  { %v1250_v16 = vadd.f32 %v3532_v9, %v1249_v15 }
 0xda2   :  { %v3156_v23 = vpop.f32.mrf.mxu1 }
 0xda3   :  { %v1255_v25 = vmul.f32 %v1254_v14, %v1250_v16  ;;  %v1334_v30 = vsub.f32 %v2880_v13, %v1250_v16  ;;  %v1332_v34 = vmul.f32 %v1331_v28, %v1250_v16  ;;  %v2894_v16 = vld [vmem:[%s4115_s0 + $0x8] sm:$0x3] }
 0xda5   :  { %v1256_v26 = vadd.f32 %v1255_v25, %v1253_v17  ;;  %v1335_v36 = vand.u32 2147483647, %v1334_v30  ;;  %v2897_v30 = vld [vmem:[%s4119_s4 + $0x8] sm:$0x3] }
 0xda7   :  { %3160 = vmatmul.mubr.msk.f32.vlgmr.msra.gmra.mxu0 %vm152_vm3, %v1256_v26 }
 0xda8   :  { %3163 = vmatpush3.msra.mxu0 %v3544_v18  ;;  %3170 = vmatprep.mubr.msk.f32.mxu0 %vm3403_vm0, %v3402_v1 }
 0xda9   :  { %3164 = vmatprep.subr.mxu0 %v3402_v1 }
 0xdaa   :  { %3165 = vmatpush3.msra.mxu0 %v3551_v19 }
 0xdab   :  { %3166 = vmatprep.subr.mxu0 %v3402_v1 }
 0xdac   :  { %3167 = vmatpush3.msra.mxu0 %v3558_v20 }
 0xdad   :  { %3168 = vmatprep.subr.mxu0 %v3402_v1 }
 0xdae   :  { %3169 = vmatpush3.msra.mxu0 %v3565_v21 }
 0xdaf   :  { %3171 = vmatmul.mubr.msk.f32.vlgmr.msra.gmra.mxu0 %vm68_vm1, %v1180_v12  ;;  %3189 = vmatprep.subr.mxu0 %v3402_v1 }
 0xdb0   :  { %3190 = vmatpush3.msk.msra.mxu0 %vm156_vm2, %v3521_v7  ;;  %3191 = vmatprep.mubr.msk.f32.mxu0 %vm3403_vm0, %v3402_v1 }
 0xdb1   :  { %3194 = vmatprep.subr.mxu0 %v3402_v1 }
 0xe67   :  { %v1326_v29 = vpop.f32.mrf.mxu0 }
 0xe68   :  { %v1327_v31 = vadd.f32 %v3594_v24, %v1326_v29 }
 0xe69   :  { %v3161_v32 = vpop.f32.mrf.mxu0 }
 0xe6a   :  { %v1330_v33 = vmul.f32 %v2883_v27, %v1327_v31  ;;  %v1336_v35 = vsub.f32 %v2880_v13, %v1327_v31  ;;  %v1697_v31 = vsub.f32 1.0, %v2897_v30 }
 0xe6c   :  { %v1333_v37 = vadd.f32 %v1332_v34, %v1330_v33  ;;  %v1337_v38 = vand.u32 2147483647, %v1336_v35 }
 0xe6e   :  { %v1338_v39 = vadd.f32 %v1337_v38, %v1335_v36  ;;  %v1339_v40 = vsub.f32 %v2880_v13, %v1333_v37  ;;  %v1355_v42 = vmul.f32 %v1333_v37, %v1254_v14 }
 0xe6f   :  { %v1425_v43 = vpop.f32.mrf.mxu0 }
 0xe70   :  { %v1356_v45 = vadd.f32 %v1355_v42, %v1253_v17  ;;  %v1340_v47 = vand.u32 2147483647, %v1339_v40 }
 0xe71   :  { %v3172_v48 = vpop.f32.mrf.mxu0 }
 0xe72   :  { %2888 = vst.msk [vmem:[%s4128_s13 + $0x6] sm:$0x3] %vm243_vm4, %v1356_v45  ;;  %3176 = vmatmul.mubr.msk.f32.vlgmr.msra.gmra.mxu1 %vm152_vm3, %v1356_v45  ;;  %v3794_v49 = vadd.f32 %v1340_v47, %v1338_v39 }
 0xe73   :  { %3179 = vmatpush3.msra.mxu1 %v3481_v0  ;;  %3186 = vmatprep.mubr.msk.f32.mxu1 %vm3403_vm0, %v3402_v1 }
 0xe74   :  { %3180 = vmatprep.subr.mxu1 %v3402_v1 }
 0xe75   :  { %3181 = vmatpush3.msra.mxu1 %v3487_v2 }
 0xe76   :  { %3182 = vmatprep.subr.mxu1 %v3402_v1 }
 0xe77   :  { %3183 = vmatpush3.msra.mxu1 %v3500_v4 }
 0xe78   :  { %3184 = vmatprep.subr.mxu1 %v3402_v1 }
 0xe79   :  { %3185 = vmatpush3.msra.mxu1 %v3509_v5 }
 0xe7a   :  { %3205 = vmatprep.subr.mxu1 %v3402_v1 }
 0xf32   :  { %v1498_v50 = vpop.f32.mrf.mxu1 }
 0xf33   :  { %v1499_v52 = vadd.f32 %v1498_v50, %v1425_v43 }
 0xf34   :  { %v3177_v53 = vpop.f32.mrf.mxu1 }
 0xf35   :  { %v1504_v54 = vadd.f32 %v2892_v51, %v1499_v52 }
 0xf37   :  { %3336 = vtanh.f32 %v1504_v54  ;;  %v2893_v56 = vmul.f32 -1.442695, %v1504_v54 }
 0xf39   :  { %3338 = vpow2.f32 %v2893_v56 }
 0xf44   :  { %v3337_v55 = vpop.eup %3336 }
 0xf45   :  { %1514 = vrot.lane.b32.xlu1 %v3337_v55, %s3404_s27 }
 0xf46   :  { %v3339_v57 = vpop.eup %3338 }
 0xf47   :  { %v1508_v59 = vadd.f32 1.0, %v3339_v57 }
 0xf49   :  { %3340 = vrcp.f32 %v1508_v59 }
 0xf56   :  { %v3341_v60 = vpop.eup %3340 }
 0xf57   :  { %v1512_v8 = vmul.f32 %v3341_v60, %v3750_v3  ;;  %v2895_v3 = vld [vmem:[%s4116_s1 + $0x8] sm:$0x3] }
 0xf58   :  { %v1620_v17 = vsub.f32 1.0, %v2895_v3  ;;  %v1619_v26 = vmul.f32 %v2895_v3, %v2894_v16 }
 0xfb7   :  { %v1515_v62 = vpop.permute.xlu1 %1514 }
 0xfb8   :  { %v1517_v63 = vmul.f32 %v3341_v60, %v1515_v62 }
 0xfba   :  { %1519 = vrot.lane.b32.xlu0 %v1517_v63, %s3405_s28 }
 0xfbe   :  { %1540 = vrot.lane.b32.xlu0 %v2898_v6, %s3406_s14  ;;  %v2912_v6 = vld [vmem:[%s4118_s3 + $0xa] sm:$0x3] }
0x102c   :  { %v1520_v10 = vpop.permute.xlu0 %1519 }
0x102d   :  { %v3816_v58 = vadd.f32 %v1520_v10, %v1512_v8 }
0x102f   :  { %3342 = vtanh.f32 %v3816_v58 }
0x1030   :  { %v1541_v61 = vpop.permute.xlu0 %1540 }
0x103c   :  { %v3343_v11 = vpop.eup %3342 }
0x103d   :  { %1525 = vrot.lane.b32.xlu1 %v3343_v11, %s3404_s27 }
0x10af   :  { %v1526_v12 = vpop.permute.xlu1 %1525 }
0x10b0   :  { %v1528_v13 = vmul.f32 %v3341_v60, %v1526_v12 }
0x10b2   :  { %v1543_v14 = vmul.f32 %v1541_v61, %v1528_v13 }
0x10b4   :  { %1545 = vrot.lane.b32.xlu1 %v1543_v14, %s3405_s28 }
0x1126   :  { %v1546_v15 = vpop.permute.xlu1 %1545 }
0x1127   :  { %3187 = vmatmul.mubr.msk.f32.vlgmr.msra.gmra.mxu1 %vm68_vm1, %v1546_v15 }
0x1128   :  { %3206 = vmatpush3.msk.msra.mxu1 %vm156_vm2, %v3571_v22  ;;  %3207 = vmatprep.mubr.msk.f32.mxu1 %vm3403_vm0, %v3402_v1 }
0x1129   :  { %3210 = vmatprep.subr.mxu1 %v3402_v1 }
0x11e7   :  { %v1615_v23 = vpop.f32.mrf.mxu1 }
0x11e8   :  { %v1616_v25 = vadd.f32 %v3532_v9, %v1615_v23 }
0x11e9   :  { %v3188_v27 = vpop.f32.mrf.mxu1 }
0x11ea   :  { %v1621_v28 = vmul.f32 %v1620_v17, %v1616_v25  ;;  %v1700_v33 = vsub.f32 %v2894_v16, %v1616_v25  ;;  %v1698_v37 = vmul.f32 %v1697_v31, %v1616_v25 }
0x11ec   :  { %v1622_v29 = vadd.f32 %v1621_v28, %v1619_v26  ;;  %v1701_v39 = vand.u32 2147483647, %v1700_v33 }
0x11ee   :  { %3192 = vmatmul.mubr.msk.f32.vlgmr.msra.gmra.mxu0 %vm152_vm3, %v1622_v29 }
0x11ef   :  { %3195 = vmatpush3.msra.mxu0 %v3544_v18  ;;  %3202 = vmatprep.mubr.msk.f32.mxu0 %vm3403_vm0, %v3402_v1 }
0x11f0   :  { %3196 = vmatprep.subr.mxu0 %v3402_v1 }
0x11f1   :  { %3197 = vmatpush3.msra.mxu0 %v3551_v19 }
0x11f2   :  { %3198 = vmatprep.subr.mxu0 %v3402_v1 }
0x11f3   :  { %3199 = vmatpush3.msra.mxu0 %v3558_v20 }
0x11f4   :  { %3200 = vmatprep.subr.mxu0 %v3402_v1 }
0x11f5   :  { %3201 = vmatpush3.msra.mxu0 %v3565_v21 }
0x11f6   :  { %3203 = vmatmul.mubr.msk.f32.vlgmr.msra.gmra.mxu0 %vm68_vm1, %v1546_v15  ;;  %3221 = vmatprep.subr.mxu0 %v3402_v1 }
0x11f7   :  { %3222 = vmatpush3.msk.msra.mxu0 %vm156_vm2, %v3521_v7  ;;  %3223 = vmatprep.mubr.msk.f32.mxu0 %vm3403_vm0, %v3402_v1 }
0x11f8   :  { %3226 = vmatprep.subr.mxu0 %v3402_v1 }
0x12ae   :  { %v1692_v32 = vpop.f32.mrf.mxu0 }
0x12af   :  { %v1693_v34 = vadd.f32 %v3594_v24, %v1692_v32 }
0x12b0   :  { %v3193_v35 = vpop.f32.mrf.mxu0 }
0x12b1   :  { %v1696_v36 = vmul.f32 %v2897_v30, %v1693_v34  ;;  %v1702_v38 = vsub.f32 %v2894_v16, %v1693_v34 }
0x12b3   :  { %v1699_v40 = vadd.f32 %v1698_v37, %v1696_v36  ;;  %v1703_v42 = vand.u32 2147483647, %v1702_v38 }
0x12b5   :  { %v1704_v43 = vadd.f32 %v1703_v42, %v1701_v39  ;;  %v1705_v45 = vsub.f32 %v2894_v16, %v1699_v40  ;;  %v1721_v47 = vmul.f32 %v1699_v40, %v1620_v17  ;;  %v2908_v16 = vld [vmem:[%s4115_s0 + $0xa] sm:$0x3] }
0x12b6   :  { %v1791_v48 = vpop.f32.mrf.mxu0 }
0x12b7   :  { %v1722_v50 = vadd.f32 %v1721_v47, %v1619_v26  ;;  %v1706_v51 = vand.u32 2147483647, %v1705_v45  ;;  %v3940_v45 = vld [vmem:[%s4121_s6 + $0x10] sm:$0xff]  ;;  %v3947_v47 = vld [vmem:[%s4121_s6 + $0x8] sm:$0xff] }
0x12b8   :  { %v3204_v52 = vpop.f32.mrf.mxu0 }
0x12b9   :  { %2902 = vst.msk [vmem:[%s4128_s13 + $0x8] sm:$0x3] %vm243_vm4, %v1722_v50  ;;  %3208 = vmatmul.mubr.msk.f32.vlgmr.msra.gmra.mxu1 %vm152_vm3, %v1722_v50  ;;  %v3860_v53 = vadd.f32 %v1706_v51, %v1704_v43  ;;  %v3931_v43 = vld [vmem:[%s4121_s6 + $0x18] sm:$0xff]  ;;  %v2920_v51 = vld [vmem:[%s4120_s5 + $0xa] sm:$0x3] }
0x12ba   :  { %3211 = vmatpush3.msra.mxu1 %v3481_v0  ;;  %3218 = vmatprep.mubr.msk.f32.mxu1 %vm3403_vm0, %v3402_v1  ;;  %v2906_v0 = vld [vmem:[%s4120_s5 + $0x8] sm:$0x3] }
0x12bb   :  { %3212 = vmatprep.subr.mxu1 %v3402_v1 }
0x12bc   :  { %3213 = vmatpush3.msra.mxu1 %v3487_v2 }
0x12bd   :  { %3214 = vmatprep.subr.mxu1 %v3402_v1 }
0x12be   :  { %3215 = vmatpush3.msra.mxu1 %v3500_v4 }
0x12bf   :  { %3216 = vmatprep.subr.mxu1 %v3402_v1 }
0x12c0   :  { %3217 = vmatpush3.msra.mxu1 %v3509_v5 }
0x12c1   :  { %3237 = vmatprep.subr.mxu1 %v3402_v1 }
0x1379   :  { %v1864_v54 = vpop.f32.mrf.mxu1 }
0x137a   :  { %v1865_v55 = vadd.f32 %v1864_v54, %v1791_v48  ;;  %v3954_v48 = vld [vmem:[%s4121_s6] sm:$0xff] }
0x137b   :  { %v3209_v56 = vpop.f32.mrf.mxu1 }
0x137c   :  { %v1870_v57 = vadd.f32 %v2906_v0, %v1865_v55 }
0x137e   :  { %3344 = vtanh.f32 %v1870_v57  ;;  %v2907_v59 = vmul.f32 -1.442695, %v1870_v57 }
0x1380   :  { %3346 = vpow2.f32 %v2907_v59 }
0x138b   :  { %v3345_v2 = vpop.eup %3344 }
0x138c   :  { %1880 = vrot.lane.b32.xlu0 %v3345_v2, %s3404_s27 }
0x138d   :  { %v3347_v4 = vpop.eup %3346 }
0x138e   :  { %v1874_v60 = vadd.f32 1.0, %v3347_v4 }
0x1390   :  { %3348 = vrcp.f32 %v1874_v60 }
0x139d   :  { %v3349_v5 = vpop.eup %3348 }
0x139e   :  { %v1878_v8 = vmul.f32 %v3349_v5, %v3816_v58  ;;  %v2909_v58 = vld [vmem:[%s4116_s1 + $0xa] sm:$0x3] }
0x139f   :  { %v1986_v17 = vsub.f32 1.0, %v2909_v58  ;;  %v1985_v26 = vmul.f32 %v2909_v58, %v2908_v16 }
0x13fe   :  { %v1881_v62 = vpop.permute.xlu0 %1880 }
0x13ff   :  { %v1883_v63 = vmul.f32 %v3349_v5, %v1881_v62 }
0x1401   :  { %1885 = vrot.lane.b32.xlu1 %v1883_v63, %s3405_s28 }
0x1405   :  { %1906 = vrot.lane.b32.xlu1 %v2912_v6, %s3406_s14 }
0x1473   :  { %v1886_v10 = vpop.permute.xlu1 %1885 }
0x1474   :  { %v3882_v11 = vadd.f32 %v1886_v10, %v1878_v8 }
0x1476   :  { %3350 = vtanh.f32 %v3882_v11 }
0x1477   :  { %v1907_v13 = vpop.permute.xlu1 %1906 }
0x1483   :  { %v3351_v12 = vpop.eup %3350 }
0x1484   :  { %1891 = vrot.lane.b32.xlu0 %v3351_v12, %s3404_s27 }
0x14f6   :  { %v1892_v61 = vpop.permute.xlu0 %1891 }
0x14f7   :  { %v1894_v14 = vmul.f32 %v3349_v5, %v1892_v61  ;;  %v2926_v5 = vld [vmem:[%s4118_s3 + $0xc] sm:$0x3] }
0x14f9   :  { %v1909_v15 = vmul.f32 %v1907_v13, %v1894_v14 }
0x14fb   :  { %1911 = vrot.lane.b32.xlu0 %v1909_v15, %s3405_s28  ;;  %v2923_v15 = vld [vmem:[%s4116_s1 + $0xc] sm:$0x3] }
0x14fc   :  { %v2352_v58 = vsub.f32 1.0, %v2923_v15 }
0x156d   :  { %v1912_v3 = vpop.permute.xlu0 %1911 }
0x156e   :  { %3219 = vmatmul.mubr.msk.f32.vlgmr.msra.gmra.mxu1 %vm68_vm1, %v1912_v3 }
0x156f   :  { %3238 = vmatpush3.msk.msra.mxu1 %vm156_vm2, %v3571_v22  ;;  %3239 = vmatprep.mubr.msk.f32.mxu1 %vm3403_vm0, %v3402_v1 }
0x1570   :  { %3242 = vmatprep.subr.mxu1 %v3402_v1 }
0x162e   :  { %v1981_v23 = vpop.f32.mrf.mxu1 }
0x162f   :  { %v1982_v25 = vadd.f32 %v3532_v9, %v1981_v23  ;;  %v2911_v9 = vld [vmem:[%s4119_s4 + $0xa] sm:$0x3] }
0x1630   :  { %v3220_v27 = vpop.f32.mrf.mxu1 }
0x1631   :  { %v1987_v22 = vmul.f32 %v1986_v17, %v1982_v25 }
0x1633   :  { %v1988_v28 = vadd.f32 %v1987_v22, %v1985_v26 }
0x1635   :  { %3224 = vmatmul.mubr.msk.f32.vlgmr.msra.gmra.mxu0 %vm152_vm3, %v1988_v28  ;;  %v3374_v28 = vld [vmem:[%s4126_s11 + $0x18] sm:$0xff] }
0x1636   :  { %3227 = vmatpush3.msra.mxu0 %v3544_v18  ;;  %3234 = vmatprep.mubr.msk.f32.mxu0 %vm3403_vm0, %v3402_v1  ;;  %v2063_v18 = vsub.f32 1.0, %v2911_v9 }
0x1637   :  { %3228 = vmatprep.subr.mxu0 %v3402_v1 }
0x1638   :  { %3229 = vmatpush3.msra.mxu0 %v3551_v19  ;;  %v2064_v31 = vmul.f32 %v2063_v18, %v1982_v25  ;;  %v3376_v18 = vld [vmem:[%s4126_s11 + $0x8] sm:$0xff] }
0x1639   :  { %3230 = vmatprep.subr.mxu0 %v3402_v1 }
0x163a   :  { %3231 = vmatpush3.msra.mxu0 %v3558_v20  ;;  %v2066_v20 = vsub.f32 %v2908_v16, %v1982_v25 }
0x163b   :  { %3232 = vmatprep.subr.mxu0 %v3402_v1 }
0x163c   :  { %3233 = vmatpush3.msra.mxu0 %v3565_v21  ;;  %v2067_v33 = vand.u32 2147483647, %v2066_v20  ;;  %v3378_v20 = vld [vmem:[%s4123_s8] sm:$0xf] }
0x163d   :  { %3235 = vmatmul.mubr.msk.f32.vlgmr.msra.gmra.mxu0 %vm68_vm1, %v1912_v3  ;;  %3253 = vmatprep.subr.mxu0 %v3402_v1  ;;  %v2922_v3 = vld [vmem:[%s4115_s0 + $0xc] sm:$0x3] }
0x163e   :  { %3254 = vmatpush3.msk.msra.mxu0 %vm156_vm2, %v3521_v7  ;;  %3255 = vmatprep.mubr.msk.f32.mxu0 %vm3403_vm0, %v3402_v1  ;;  %v2351_v25 = vmul.f32 %v2923_v15, %v2922_v3 }
0x163f   :  { %3258 = vmatprep.subr.mxu0 %v3402_v1 }
0x16f5   :  { %v2058_v19 = vpop.f32.mrf.mxu0 }
0x16f6   :  { %v2059_v21 = vadd.f32 %v3594_v24, %v2058_v19  ;;  %v3377_v19 = vld [vmem:[%s4126_s11] sm:$0xff] }
0x16f7   :  { %v3225_v29 = vpop.f32.mrf.mxu0 }
0x16f8   :  { %v2062_v30 = vmul.f32 %v2911_v9, %v2059_v21  ;;  %v2068_v32 = vsub.f32 %v2908_v16, %v2059_v21  ;;  %v3375_v9 = vld [vmem:[%s4126_s11 + $0x10] sm:$0xff]  ;;  %v2925_v21 = vld [vmem:[%s4119_s4 + $0xc] sm:$0x3] }
0x16f9   :  { %v2429_v29 = vsub.f32 1.0, %v2925_v21 }
0x16fa   :  { %v2065_v7 = vadd.f32 %v2064_v31, %v2062_v30  ;;  %v2069_v34 = vand.u32 2147483647, %v2068_v32  ;;  %v4025_v32 = vld [vmem:[%s4124_s9] ss:$0 sm:$0xff] }
0x16fc   :  { %v2070_v35 = vadd.f32 %v2069_v34, %v2067_v33  ;;  %v2071_v36 = vsub.f32 %v2908_v16, %v2065_v7  ;;  %v2087_v37 = vmul.f32 %v2065_v7, %v1986_v17  ;;  %v3990_v17 = vld [vmem:[%s4122_s7] ss:$0 sm:$0xff] }
0x16fd   :  { %v2157_v38 = vpop.f32.mrf.mxu0 }
0x16fe   :  { %v2088_v39 = vadd.f32 %v2087_v37, %v1985_v26  ;;  %v2072_v40 = vand.u32 2147483647, %v2071_v36 }
0x16ff   :  { %v3236_v42 = vpop.f32.mrf.mxu0 }
0x1700   :  { %2916 = vst.msk [vmem:[%s4128_s13 + $0xa] sm:$0x3] %vm243_vm4, %v2088_v39  ;;  %3240 = vmatmul.mubr.msk.f32.vlgmr.msra.gmra.mxu1 %vm152_vm3, %v2088_v39  ;;  %v3926_v24 = vadd.f32 %v2072_v40, %v2070_v35 }
0x1701   :  { %3243 = vmatpush3.msra.mxu1 %v3931_v43  ;;  %3250 = vmatprep.mubr.msk.f32.mxu1 %vm3403_vm0, %v3402_v1 }
0x1702   :  { %3244 = vmatprep.subr.mxu1 %v3402_v1 }
0x1703   :  { %3245 = vmatpush3.msra.mxu1 %v3940_v45 }
0x1704   :  { %3246 = vmatprep.subr.mxu1 %v3402_v1 }
0x1705   :  { %3247 = vmatpush3.msra.mxu1 %v3947_v47 }
0x1706   :  { %3248 = vmatprep.subr.mxu1 %v3402_v1 }
0x1707   :  { %3249 = vmatpush3.msra.mxu1 %v3954_v48 }
0x1708   :  { %3269 = vmatprep.subr.mxu1 %v3402_v1 }
0x17c0   :  { %v2230_v50 = vpop.f32.mrf.mxu1 }
0x17c1   :  { %v2231_v52 = vadd.f32 %v2230_v50, %v2157_v38 }
0x17c2   :  { %v3241_v54 = vpop.f32.mrf.mxu1 }
0x17c3   :  { %v2236_v0 = vadd.f32 %v2920_v51, %v2231_v52 }
0x17c5   :  { %3352 = vtanh.f32 %v2236_v0  ;;  %v2921_v56 = vmul.f32 -1.442695, %v2236_v0 }
0x17c7   :  { %3354 = vpow2.f32 %v2921_v56 }
0x17d2   :  { %v3353_v55 = vpop.eup %3352 }
0x17d3   :  { %2246 = vrot.lane.b32.xlu1 %v3353_v55, %s3404_s27 }
0x17d4   :  { %v3355_v57 = vpop.eup %3354 }
0x17d5   :  { %v2240_v2 = vadd.f32 1.0, %v3355_v57 }
0x17d7   :  { %3356 = vrcp.f32 %v2240_v2 }
0x17e4   :  { %v3357_v59 = vpop.eup %3356 }
0x17e5   :  { %v2244_v62 = vmul.f32 %v3357_v59, %v3882_v11  ;;  %v3372_v11 = vld [vmem:[%s4125_s10] sm:$0xf]  ;;  %s3407_s10 = smov [#allocation2]  }
0x17e6   :  { %s2831_s20 = sshll.u32 %s3407_s10, 4  ;;  %s2832_s20 = int_to_ptr.vmem [resolvable:$true] %s2831_s20 }
0x17e7   :  { %s3380_s21 = scalar_lea.vmem %s2832_s20, 16  ;;  %s3384_s22 = scalar_lea.vmem %s2832_s20, 32 }
0x17e8   :  { %p3381_p0 = scmp.ne.s32.totalorder %s2832_s20, %s3380_s21  ;;  %p3385_p1 = scmp.lt.s32.totalorder %s2832_s20, %s2832_s20 }
0x17e9   :  { %p3386_p2 = scmp.lt.s32.totalorder %s3384_s22, %s3380_s21 }
0x17eb   :  { %p3387_p3 = por %p3386_p2, %p3385_p1 }
0x17ed   :  { %p3388_p4 = pnand %p3387_p3, %p3381_p0 }
0x1845   :  { %v2247_v4 = vpop.permute.xlu1 %2246 }
0x1846   :  { %v2249_v60 = vmul.f32 %v3357_v59, %v2247_v4 }
0x1848   :  { %2251 = vrot.lane.b32.xlu0 %v2249_v60, %s3405_s28 }
0x184c   :  { %2272 = vrot.lane.b32.xlu0 %v2926_v5, %s3406_s14 }
0x18ba   :  { %v2252_v63 = vpop.permute.xlu0 %2251 }
0x18bb   :  { %v3968_v6 = vadd.f32 %v2252_v63, %v2244_v62  ;;  %v2940_v62 = vld [vmem:[%s4118_s3 + $0xe] sm:$0x3]  ;;  %v58_v63 = vld [vmem:[%s4117_s2] sm:$0x3] }
0x18bd   :  { %3358 = vtanh.f32 %v3968_v6 }
0x18be   :  { %v2273_v12 = vpop.permute.xlu0 %2272 }
0x18ca   :  { %v3359_v8 = vpop.eup %3358 }
0x18cb   :  { %2257 = vrot.lane.b32.xlu1 %v3359_v8, %s3404_s27  ;;  %v242_v8 = vmul.f32 %v3602_v41, %v58_v63 }
0x193d   :  { %v2258_v10 = vpop.permute.xlu1 %2257 }
0x193e   :  { %v2260_v61 = vmul.f32 %v3357_v59, %v2258_v10  ;;  %v2882_v10 = vld [vmem:[%s4117_s2 + $0x6] sm:$0x3] }
0x1940   :  { %v2275_v13 = vmul.f32 %v2273_v12, %v2260_v61  ;;  %v244_v12 = vsel %vm243_vm4, %v242_v8, 0.0  ;;  %v1342_v61 = vmul.f32 %v2882_v10, %v3794_v49 }
0x1942   :  { %2277 = vrot.lane.b32.xlu1 %v2275_v13, %s3405_s28  ;;  %v2910_v13 = vld [vmem:[%s4117_s2 + $0xa] sm:$0x3] }
0x19b4   :  { %v2278_v14 = vpop.permute.xlu1 %2277 }
0x19b5   :  { %3251 = vmatmul.mubr.msk.f32.vlgmr.msra.gmra.mxu1 %vm68_vm1, %v2278_v14 }
0x19b6   :  { %3270 = vmatpush3.msk.msra.mxu1 %vm156_vm2, %v3372_v11  ;;  %3271 = vmatprep.mubr.msk.f32.mxu1 %vm3403_vm0, %v3402_v1  ;;  %v2074_v11 = vmul.f32 %v2910_v13, %v3926_v24 }
0x19b7   :  { %3274 = vmatprep.subr.mxu1 %v3402_v1 }
0x19b8   :  { %v2075_v41 = vsel %vm243_vm4, %v2074_v11, 0.0 }
0x1a75   :  { %v2347_v16 = vpop.f32.mrf.mxu1 }
0x1a76   :  { %v2348_v23 = vadd.f32 %v3990_v17, %v2347_v16 }
0x1a77   :  { %v3252_v26 = vpop.f32.mrf.mxu1 }
0x1a78   :  { %v2353_v27 = vmul.f32 %v2352_v58, %v2348_v23  ;;  %v2432_v31 = vsub.f32 %v2922_v3, %v2348_v23  ;;  %v2430_v35 = vmul.f32 %v2429_v29, %v2348_v23 }
0x1a7a   :  { %v2354_v22 = vadd.f32 %v2353_v27, %v2351_v25  ;;  %v2433_v37 = vand.u32 2147483647, %v2432_v31  ;;  %v2896_v31 = vld [vmem:[%s4117_s2 + $0x8] sm:$0x3] }
0x1a7c   :  { %3256 = vmatmul.mubr.msk.f32.vlgmr.msra.gmra.mxu0 %vm152_vm3, %v2354_v22 }
0x1a7d   :  { %3259 = vmatpush3.msra.mxu0 %v3374_v28  ;;  %3266 = vmatprep.mubr.msk.f32.mxu0 %vm3403_vm0, %v3402_v1 }
0x1a7e   :  { %3260 = vmatprep.subr.mxu0 %v3402_v1 }
0x1a7f   :  { %3261 = vmatpush3.msra.mxu0 %v3375_v9 }
0x1a80   :  { %3262 = vmatprep.subr.mxu0 %v3402_v1 }
0x1a81   :  { %3263 = vmatpush3.msra.mxu0 %v3376_v18 }
0x1a82   :  { %3264 = vmatprep.subr.mxu0 %v3402_v1 }
0x1a83   :  { %3265 = vmatpush3.msra.mxu0 %v3377_v19 }
0x1a84   :  { %3267 = vmatmul.mubr.msk.f32.vlgmr.msra.gmra.mxu0 %vm68_vm1, %v2278_v14  ;;  %3285 = vmatprep.subr.mxu0 %v3402_v1  ;;  %v1343_v14 = vsel %vm243_vm4, %v1342_v61, 0.0 }
0x1a85   :  { %3286 = vmatpush3.msk.msra.mxu0 %vm156_vm2, %v3378_v20  ;;  %3287 = vmatprep.mubr.msk.f32.mxu0 %vm3403_vm0, %v3402_v1 }
0x1b3c   :  { %v2424_v30 = vpop.f32.mrf.mxu0 }
0x1b3d   :  { %v2425_v33 = vadd.f32 %v4025_v32, %v2424_v30 }
0x1b3e   :  { %v3257_v7 = vpop.f32.mrf.mxu0 }
0x1b3f   :  { %v2428_v34 = vmul.f32 %v2925_v21, %v2425_v33  ;;  %v2434_v36 = vsub.f32 %v2922_v3, %v2425_v33  ;;  %v2868_v21 = vld [vmem:[%s4117_s2 + $0x4] sm:$0x3]  ;;  %v1708_v7 = vmul.f32 %v2896_v31, %v3860_v53 }
0x1b40   :  { %v976_v30 = vmul.f32 %v2868_v21, %v3728_v46  ;;  %v2939_v21 = vld [vmem:[%s4119_s4 + $0xe] sm:$0x3] }
0x1b41   :  { %v2431_v38 = vadd.f32 %v2430_v35, %v2428_v34  ;;  %v2435_v39 = vand.u32 2147483647, %v2434_v36  ;;  %v1709_v34 = vsel %vm243_vm4, %v1708_v7, 0.0 }
0x1b42   :  { %v977_v33 = vsel %vm243_vm4, %v976_v30, 0.0 }
0x1b43   :  { %v2436_v40 = vadd.f32 %v2435_v39, %v2433_v37  ;;  %v2437_v42 = vsub.f32 %v2922_v3, %v2431_v38  ;;  %v2453_v50 = vmul.f32 %v2431_v38, %v2352_v58 }
0x1b44   :  { %v2523_v51 = vpop.f32.mrf.mxu0 }
0x1b45   :  { %v2454_v52 = vadd.f32 %v2453_v50, %v2351_v25  ;;  %v2438_v54 = vand.u32 2147483647, %v2437_v42 }
0x1b46   :  { %v3268_v0 = vpop.f32.mrf.mxu0 }
0x1b47   :  { %2930 = vst.msk [vmem:[%s4128_s13 + $0xc] sm:$0x3] %vm243_vm4, %v2454_v52  ;;  %3272 = vmatmul.mubr.msk.f32.vlgmr.msra.gmra.mxu1 %vm152_vm3, %v2454_v52  ;;  %v4033_v55 = vadd.f32 %v2438_v54, %v2436_v40 }
0x1b48   :  { %3275 = vmatpush3.msra.mxu1 %v3931_v43  ;;  %3282 = vmatprep.mubr.msk.f32.mxu1 %vm3403_vm0, %v3402_v1  ;;  %v2934_v43 = vld [vmem:[%s4120_s5 + $0xc] sm:$0x3] }
0x1b49   :  { %3276 = vmatprep.subr.mxu1 %v3402_v1 }
0x1b4a   :  { %3277 = vmatpush3.msra.mxu1 %v3940_v45 }
0x1b4b   :  { %3278 = vmatprep.subr.mxu1 %v3402_v1 }
0x1b4c   :  { %3279 = vmatpush3.msra.mxu1 %v3947_v47 }
0x1b4d   :  { %3280 = vmatprep.subr.mxu1 %v3402_v1 }
0x1b4e   :  { %3281 = vmatpush3.msra.mxu1 %v3954_v48 }
0x1c07   :  { %v2596_v56 = vpop.f32.mrf.mxu1 }
0x1c08   :  { %v2597_v57 = vadd.f32 %v2596_v56, %v2523_v51 }
0x1c09   :  { %v3273_v2 = vpop.f32.mrf.mxu1 }
0x1c0a   :  { %v2602_v59 = vadd.f32 %v2934_v43, %v2597_v57 }
0x1c0c   :  { %3360 = vtanh.f32 %v2602_v59  ;;  %v2935_v45 = vmul.f32 -1.442695, %v2602_v59 }
0x1c0e   :  { %3362 = vpow2.f32 %v2935_v45 }
0x1c19   :  { %v3361_v4 = vpop.eup %3360 }
0x1c1a   :  { %2612 = vrot.lane.b32.xlu0 %v3361_v4, %s3404_s27 }
0x1c1b   :  { %v3363_v60 = vpop.eup %3362 }
0x1c1c   :  { %v2606_v47 = vadd.f32 1.0, %v3363_v60 }
0x1c1e   :  { %3364 = vrcp.f32 %v2606_v47 }
0x1c2b   :  { %v3365_v1 = vpop.eup %3364 }
0x1c2c   :  { %v2610_v15 = vmul.f32 %v3365_v1, %v3968_v6  ;;  %v2854_v6 = vld [vmem:[%s4117_s2 + $0x2] sm:$0x3] }
0x1c2d   :  { %v610_v20 = vmul.f32 %v2854_v6, %v3662_v44  ;;  %v2924_v44 = vld [vmem:[%s4117_s2 + $0xc] sm:$0x3] }
0x1c2e   :  { %v2440_v35 = vmul.f32 %v2924_v44, %v4033_v55 }
0x1c2f   :  { %v611_v29 = vsel %vm243_vm4, %v610_v20, 0.0 }
0x1c30   :  { %v2441_v46 = vsel %vm243_vm4, %v2440_v35, 0.0 }
0x1c8c   :  { %v2613_v5 = vpop.permute.xlu0 %2612 }
0x1c8d   :  { %v2615_v48 = vmul.f32 %v3365_v1, %v2613_v5 }
0x1c8f   :  { %2617 = vrot.lane.b32.xlu1 %v2615_v48, %s3405_s28 }
0x1c93   :  { %2638 = vrot.lane.b32.xlu1 %v2940_v62, %s3406_s14 }
0x1cb7   :  { %245 = vadd.xlane.f32.xlu1 %v244_v12 }
0x1cbb   :  { %1344 = vadd.xlane.f32.xlu1 %v1343_v14 }
0x1cbf   :  { %2076 = vadd.xlane.f32.xlu1 %v2075_v41 }
0x1d01   :  { %v2618_v3 = vpop.permute.xlu1 %2617 }
0x1d02   :  { %v2620_v58 = vadd.f32 %v2618_v3, %v2610_v15 }
0x1d04   :  { %3366 = vtanh.f32 %v2620_v58 }
0x1d05   :  { %v2639_v49 = vpop.permute.xlu1 %2638 }
0x1d11   :  { %v3367_v16 = vpop.eup %3366 }
0x1d12   :  { %2623 = vrot.lane.b32.xlu0 %v3367_v16, %s3404_s27 }
0x1d40   :  { %v246_v23 = vpop.xlane.xlu1 %245 }
0x1d41   :  { %v247_v25 = vrot.slane %v246_v23, 4 }
0x1d43   :  { %v248_v26 = vadd.f32 %v247_v25, %v246_v23 }
0x1d44   :  { %v1345_v37 = vpop.xlane.xlu1 %1344 }
0x1d45   :  { %v249_v27 = vrot.slane %v248_v26, 2  ;;  %v1346_v38 = vrot.slane %v1345_v37, 4 }
0x1d47   :  { %v250_v22 = vadd.f32 %v249_v27, %v248_v26  ;;  %v1347_v53 = vadd.f32 %v1346_v38, %v1345_v37  ;;  %v2937_v27 = vld [vmem:[%s4116_s1 + $0xe] sm:$0x3] }
0x1d48   :  { %v2077_v39 = vpop.xlane.xlu1 %2076 }
0x1d49   :  { %v251_v28 = vrot.slane %v250_v22, 1  ;;  %v2078_v40 = vrot.slane %v2077_v39, 4  ;;  %v1348_v52 = vrot.slane %v1347_v53, 2 }
0x1d4b   :  { %v252_v24 = vadd.f32 %v251_v28, %v250_v22  ;;  %v2079_v54 = vadd.f32 %v2078_v40, %v2077_v39  ;;  %v1349_v4 = vadd.f32 %v1348_v52, %v1347_v53  ;;  %v2936_v22 = vld [vmem:[%s4115_s0 + $0xe] sm:$0x3]  ;;  %v2718_v28 = vsub.f32 1.0, %v2937_v27 }
0x1d4d   :  { %3290 = vpush %v252_v24  ;;  %v2080_v2 = vrot.slane %v2079_v54, 2  ;;  %v1350_v63 = vrot.slane %v1349_v4, 1 }
0x1d4f   :  { %v2081_v8 = vadd.f32 %v2080_v2, %v2079_v54  ;;  %v1351_v41 = vadd.f32 %v1350_v63, %v1349_v4 }
0x1d51   :  { %v2082_v15 = vrot.slane %v2081_v8, 1 }
0x1d53   :  { %v2083_v23 = vadd.f32 %v2082_v15, %v2081_v8 }
0x1d7e   :  { %s3291_s16 = spop %3290 }
0x1d84   :  { %v2624_v9 = vpop.permute.xlu0 %2623 }
0x1d85   :  { %v2626_v18 = vmul.f32 %v3365_v1, %v2624_v9 }
0x1d87   :  { %v2641_v19 = vmul.f32 %v2639_v49, %v2626_v18  ;;  %v2717_v18 = vmul.f32 %v2937_v27, %v2936_v22 }
0x1d89   :  { %2643 = vrot.lane.b32.xlu0 %v2641_v19, %s3405_s28 }
0x1da8   :  { %612 = vadd.xlane.f32.xlu0 %v611_v29  ;;  %v2795_v29 = vsub.f32 1.0, %v2939_v21 }
0x1dac   :  { %978 = vadd.xlane.f32.xlu0 %v977_v33 }
0x1db0   :  { %1710 = vadd.xlane.f32.xlu0 %v1709_v34 }
0x1db4   :  { %2442 = vadd.xlane.f32.xlu0 %v2441_v46 }
0x1dfb   :  { %v2644_v36 = vpop.permute.xlu0 %2643 }
0x1dfc   :  { %3283 = vmatmul.mubr.msk.f32.vlgmr.msra.gmra.mxu1 %vm68_vm1, %v2644_v36 }
0x1e31   :  { %v613_v42 = vpop.xlane.xlu0 %612 }
0x1e32   :  { %v614_v50 = vrot.slane %v613_v42, 4 }
0x1e34   :  { %v615_v51 = vadd.f32 %v614_v50, %v613_v42  ;;  %v2938_v42 = vld [vmem:[%s4117_s2 + $0xe] sm:$0x3] }
0x1e35   :  { %v979_v0 = vpop.xlane.xlu0 %978 }
0x1e36   :  { %v616_v56 = vrot.slane %v615_v51, 2  ;;  %v980_v55 = vrot.slane %v979_v0, 4 }
0x1e38   :  { %v981_v43 = vadd.f32 %v980_v55, %v979_v0  ;;  %v617_v57 = vadd.f32 %v616_v56, %v615_v51 }
0x1e39   :  { %v1711_v59 = vpop.xlane.xlu0 %1710 }
0x1e3a   :  { %v982_v45 = vrot.slane %v981_v43, 2  ;;  %v1712_v60 = vrot.slane %v1711_v59, 4  ;;  %v618_v47 = vrot.slane %v617_v57, 1 }
0x1e3c   :  { %v1713_v1 = vadd.f32 %v1712_v60, %v1711_v59  ;;  %v619_v5 = vadd.f32 %v618_v47, %v617_v57  ;;  %v983_v48 = vadd.f32 %v982_v45, %v981_v43  ;;  %v254_v59 = vstv %s3291_s16 }
0x1e3d   :  { %v2443_v62 = vpop.xlane.xlu0 %2442 }
0x1e3e   :  { %v1714_v10 = vrot.slane %v1713_v1, 2  ;;  %v2444_v12 = vrot.slane %v2443_v62, 4  ;;  %3292 = vpush %v619_v5  ;;  %v984_v61 = vrot.slane %v983_v48, 1 }
0x1e40   :  { %v2445_v13 = vadd.f32 %v2444_v12, %v2443_v62  ;;  %v985_v14 = vadd.f32 %v984_v61, %v983_v48  ;;  %v1715_v11 = vadd.f32 %v1714_v10, %v1713_v1 }
0x1e42   :  { %v2446_v3 = vrot.slane %v2445_v13, 2  ;;  %3294 = vpush %v985_v14  ;;  %v1716_v58 = vrot.slane %v1715_v11, 1 }
0x1e43   :  { %3296 = vpush %v1351_v41 }
0x1e44   :  { %v2447_v16 = vadd.f32 %v2446_v3, %v2445_v13  ;;  %v1717_v49 = vadd.f32 %v1716_v58, %v1715_v11 }
0x1e46   :  { %3298 = vpush %v1717_v49  ;;  %v2448_v25 = vrot.slane %v2447_v16, 1 }
0x1e47   :  { %3300 = vpush %v2083_v23 }
0x1e48   :  { %v2449_v26 = vadd.f32 %v2448_v25, %v2447_v16 }
0x1e4a   :  { %3302 = vpush %v2449_v26 }
0x1e6f   :  { %s3293_s2 = spop %3292 }
0x1e70   :  { %v621_v2 = vstv %s3293_s2 }
0x1e71   :  { %v622_v45 = vadd.f32 %v621_v2, %v254_v59 }
0x1e73   :  { %s3295_s17 = spop %3294 }
0x1e74   :  { %v987_v4 = vstv %s3295_s17 }
0x1e75   :  { %v988_v60 = vadd.f32 %v987_v4, %v622_v45 }
0x1ebc   :  { %v2713_v24 = vpop.f32.mrf.mxu1 }
0x1ebd   :  { %v2714_v9 = vadd.f32 %v3990_v17, %v2713_v24 }
0x1ebe   :  { %v3284_v19 = vpop.f32.mrf.mxu1 }
0x1ebf   :  { %v2719_v6 = vmul.f32 %v2718_v28, %v2714_v9  ;;  %v2798_v7 = vsub.f32 %v2936_v22, %v2714_v9  ;;  %v2796_v34 = vmul.f32 %v2795_v29, %v2714_v9 }
0x1ec1   :  { %v2720_v20 = vadd.f32 %v2719_v6, %v2717_v18  ;;  %v2799_v36 = vand.u32 2147483647, %v2798_v7 }
0x1ec3   :  { %3288 = vmatmul.mubr.msk.f32.vlgmr.msra.gmra.mxu0 %vm152_vm3, %v2720_v20 }
0x1f83   :  { %v2790_v30 = vpop.f32.mrf.mxu0 }
0x1f84   :  { %v2791_v31 = vadd.f32 %v4025_v32, %v2790_v30 }
0x1f85   :  { %v3289_v33 = vpop.f32.mrf.mxu0 }
0x1f86   :  { %v2794_v44 = vmul.f32 %v2939_v21, %v2791_v31  ;;  %v2800_v35 = vsub.f32 %v2936_v22, %v2791_v31 }
0x1f88   :  { %v2797_v17 = vadd.f32 %v2796_v34, %v2794_v44  ;;  %v2801_v46 = vand.u32 2147483647, %v2800_v35 }
0x1f8a   :  { %v2803_v37 = vsub.f32 %v2936_v22, %v2797_v17  ;;  %v2819_v38 = vmul.f32 %v2797_v17, %v2718_v28  ;;  %v2802_v39 = vadd.f32 %v2801_v46, %v2799_v36 }
0x1f8c   :  { %v2820_v53 = vadd.f32 %v2819_v38, %v2717_v18  ;;  %v2804_v40 = vand.u32 2147483647, %v2803_v37 }
0x1f8e   :  { %2944 = vst.msk [vmem:[%s4128_s13 + $0xe] sm:$0x3] %vm243_vm4, %v2820_v53  ;;  %v2805_v32 = vadd.f32 %v2804_v40, %v2802_v39  ;;  %s3297_s13 = spop %3296 }
0x1f8f   :  { %s3299_s18 = spop %3298  ;;  %v1353_v47 = vstv %s3297_s13 }
0x1f90   :  { %v2806_v50 = vmul.f32 %v2938_v42, %v2805_v32  ;;  %v1354_v1 = vadd.f32 %v1353_v47, %v988_v60  ;;  %v1719_v5 = vstv %s3299_s18  ;;  %s3301_s19 = spop %3300 }
0x1f91   :  { %s3303_s5 = spop %3302  ;;  %v2085_v62 = vstv %s3301_s19 }
0x1f92   :  { %v2807_v51 = vsel %vm243_vm4, %v2806_v50, 0.0  ;;  %v1720_v48 = vadd.f32 %v1719_v5, %v1354_v1  ;;  %v2451_v8 = vstv %s3303_s5 }
0x1f93   :  { %2808 = vadd.xlane.f32.xlu1 %v2807_v51 }
0x1f94   :  { %v2086_v63 = vadd.f32 %v2085_v62, %v1720_v48 }
0x1f96   :  { %v2452_v10 = vadd.f32 %v2451_v8, %v2086_v63 }
0x201c   :  { %v2809_v52 = vpop.xlane.xlu1 %2808 }
0x201d   :  { %v2810_v54 = vrot.slane %v2809_v52, 4 }
0x201f   :  { %v2811_v0 = vadd.f32 %v2810_v54, %v2809_v52 }
0x2021   :  { %v2812_v56 = vrot.slane %v2811_v0, 2 }
0x2023   :  { %v2813_v55 = vadd.f32 %v2812_v56, %v2811_v0 }
0x2025   :  { %v2814_v43 = vrot.slane %v2813_v55, 1 }
0x2027   :  { %v2815_v57 = vadd.f32 %v2814_v43, %v2813_v55 }
0x2029   :  { %3304 = vpush %v2815_v57 }
0x205a   :  { %s3305_s7 = spop %3304 }
0x205b   :  { %v2817_v12 = vstv %s3305_s7 }
0x205c   :  { %v2818_v61 = vadd.f32 %v2817_v12, %v2452_v10 }
0x205e   :  { %2824 = vst.msk [vmem:[#allocation2] sm:$0x1] %vm2823_vm5, %v2818_v61 }
0x205f   :  { %3391 = shalt.err (!%p3388_p4)
}
0x2060   :  { %2834 = dma.vmem_to_hbm [thread:$0]  %s2832_s20, 16, %s4127_s12, [#allocation3]  }
0x2061   :  { %3400 = dma.done.wait [#allocation3], 16  }
0x2062   :  { %3401 = vsyncadd [#allocation3], 4294967280 }
0x2063   :  { %2842 = vsyncpa [#allocation3], 1 }

</bundles_post_ra>
